<compile_context>
chip_gen: v6e
topology: v6e:2x2x1
jax: 0.10.0
libtpu: 0.0.40
codegen_flags: <defaults>
</compile_context>

<pallas_src>
import functools

import jax
import jax.numpy as jnp
from jax.experimental import pallas as pl
from jax.experimental.pallas import tpu as pltpu


# ------------------------------- helpers ----------------------------------- #
_ACC_BUDGET = 192 * 1024     # f32 accumulator tile budget (review item 7)
_TP_CAP = 1024               # lane-tile cap (also bounds tap-copy unrolling)
_TAPS_BUDGET = 4 << 20       # bf16 tap-matrix scratch budget


def _round_up(x, m):
    return ((x + m - 1) // m) * m


def _resident_spec(shape, index_map):
    """BlockSpec for an operand whose block index never changes.

    Single-buffering (pl.Buffered(1)) halves its VMEM footprint, which matters
    on v7x (64 MiB physical VMEM) at production widths.  Falls back to a plain
    spec if this Pallas build does not accept pipeline_mode."""
    try:
        return pl.BlockSpec(shape, index_map, pipeline_mode=pl.Buffered(1))
    except Exception:   # pragma: no cover - older Pallas without pipeline_mode
        return pl.BlockSpec(shape, index_map)


def _pick_band_rows(Ho, Wo, Cout, K):
    """Largest output-row band TH (TH | Ho) giving a lane-dense, VMEM-bounded tile."""
    best = None
    for th in range(1, Ho + 1):
        if Ho % th:
            continue
        tp = th * Wo
        if tp % 128 or tp > _TP_CAP:
            continue
        if Cout * tp * 4 > _ACC_BUDGET or K * tp * 2 > _TAPS_BUDGET:
            continue
        best = th
    return best


# ----------------------------- Pallas kernels ------------------------------ #
def _halo_conv_kernel(*refs, tap_offsets, cin, th, wo, leaky, has_shift,
                      negative_slope=0.01):
    """One (batch, row-band) block: DMA haloed band, build taps, matmul, epilogue.

    refs = (x_hbm, w, b, [shift], out, band_scratch, taps_scratch)
      x_hbm: (N, C_eff, H_eff, W_eff) bf16 in HBM (pl.ANY)  -- manual DMA
      w:     (Cout, K)  bf16   folded weights (BN scale applied), K = KH*KW*Cin
      b:     (Cout, 1)  f32    folded bias
      shift: (Cout, 1)  f32    BN shift (only for BN layers)
      out:   (1, Cout, TH*Wo)
      band_scratch: (C_eff, R_band, W_eff) bf16 VMEM
      taps_scratch: (K, TH*Wo)             bf16 VMEM
    """
    if has_shift:
        x_ref, w_ref, b_ref, shift_ref, o_ref, band_ref, taps_ref = refs
    else:
        x_ref, w_ref, b_ref, o_ref, band_ref, taps_ref = refs
        shift_ref = None

    n = pl.program_id(0)
    band = pl.program_id(1)
    rband = band_ref.shape[1]
    row0 = pl.multiple_of(band * th, th)

    # Haloed row band, HBM -> VMEM (input-side traffic ~1.1x instead of 9x).
    # TODO(synk): double-buffer this DMA across bands (make_async_copy + slot
    # semaphores) to hide its latency behind the matmul.
    pltpu.sync_copy(x_ref.at[n, :, pl.ds(row0, rband), :], band_ref)

    # Assemble the im2col tap matrix in VMEM with static, contiguous copies.
    for ti, (cb, ro, co) in enumerate(tap_offsets):
        k0 = ti * cin
        for t in range(th):
            taps_ref[k0:k0 + cin, t * wo:(t + 1) * wo] = (
                band_ref[cb:cb + cin, ro + t, co:co + wo])

    acc = jnp.dot(w_ref[...], taps_ref[...],
                  preferred_element_type=jnp.float32)       # (Cout, TH*Wo) f32
    y = acc + b_ref[...]
    if leaky:   # swish() in the reference == nn.LeakyReLU(0.01)
        y = jnp.where(y >= 0, y, negative_slope * y)
    if has_shift:
        y = y + shift_ref[...]
    o_ref[0] = y.astype(o_ref.dtype)


def _dense_conv_kernel(*refs, leaky, has_shift, sigmoid, negative_slope=0.01):
    """Small-layer conv as a dense matmul over batch-folded lanes.

    refs = (taps, w, b, [shift], out)
      taps: (K, TP) bf16  im2col columns, batch folded into lanes
      w:    (TCo, K) bf16;  b/shift: (TCo, 1) f32;  out: (TCo, TP)
    """
    if has_shift:
        x_ref, w_ref, b_ref, shift_ref, o_ref = refs
    else:
        x_ref, w_ref, b_ref, o_ref = refs
        shift_ref = None
    acc = jnp.dot(w_ref[...], x_ref[...], preferred_element_type=jnp.float32)
    y = acc + b_ref[...]
    if leaky:
        y = jnp.where(y >= 0, y, negative_slope * y)
    if has_shift:
        y = y + shift_ref[...]
    if sigmoid:
        y = jax.nn.sigmoid(y)
    o_ref[...] = y.astype(o_ref.dtype)


# ------------------------------ conv wrappers ------------------------------ #
def conv2d_dense(x, w, bias, shift, *, stride, pad, leaky, sigmoid=False,
                 out_dtype=jnp.bfloat16):
    """Conv (+LeakyReLU +folded BN [+sigmoid]) as one lane-dense matmul.

    Used for small spatial planes: batch is folded into the lane dim so every
    store is >=128 lanes wide; the tiny HBM im2col here is negligible."""
    N, Cin, H, W = x.shape
    Cout, _, KH, KW = w.shape
    Ho = (H + 2 * pad - KH) // stride + 1
    Wo = (W + 2 * pad - KW) // stride + 1
    P = Ho * Wo
    K = KH * KW * Cin

    xb = x.astype(jnp.bfloat16)
    xp = jnp.pad(xb, ((0, 0), (0, 0), (pad, pad), (pad, pad)))
    cols = []
    for kh in range(KH):
        for kw in range(KW):
            sl = xp[:, :,
                    kh:kh + stride * (Ho - 1) + 1:stride,
                    kw:kw + stride * (Wo - 1) + 1:stride]
            cols.append(sl.reshape(N, Cin, P))
    taps = jnp.concatenate(cols, axis=1)                       # (N, K, P)
    taps = jnp.transpose(taps, (1, 0, 2)).reshape(K, N * P)    # batch -> lanes

    TPd = min(512, _round_up(N * P, 128))
    NPp = _round_up(N * P, TPd)
    taps = jnp.pad(taps, ((0, 0), (0, NPp - N * P)))

    # Split Cout so the grid has >=2 parallel steps (keeps v7x's 2nd TC busy).
    TCo = Cout // 2 if (Cout >= 16 and Cout % 16 == 0) else Cout

    w2d = jnp.transpose(w, (0, 2, 3, 1)).reshape(Cout, K).astype(jnp.bfloat16)
    b2 = bias.reshape(Cout, 1).astype(jnp.float32)
    args = [taps, w2d, b2]
    has_shift = shift is not None
    if has_shift:
        args.append(shift.reshape(Cout, 1).astype(jnp.float32))

    kernel = functools.partial(_dense_conv_kernel, leaky=leaky,
                               has_shift=has_shift, sigmoid=sigmoid)

    in_specs = [pl.BlockSpec((K, TPd), lambda i, j: (0, j)),
                pl.BlockSpec((TCo, K), lambda i, j: (i, 0)),
                pl.BlockSpec((TCo, 1), lambda i, j: (i, 0))]
    if has_shift:
        in_specs.append(pl.BlockSpec((TCo, 1), lambda i, j: (i, 0)))

    out_bytes = jnp.dtype(out_dtype).itemsize
    est = 2 * (K * TPd * 2 + TCo * K * 2 + 2 * TCo * 4
               + TCo * TPd * out_bytes) + TCo * TPd * 4
    vmem_limit = min(int(est * 1.5) + (4 << 20), 64 << 20)

    out2d = pl.pallas_call(
        kernel,
        out_shape=jax.ShapeDtypeStruct((Cout, NPp), out_dtype),
        grid_spec=pltpu.PrefetchScalarGridSpec(
            num_scalar_prefetch=0,
            grid=(Cout // TCo, NPp // TPd),
            in_specs=in_specs,
            out_specs=pl.BlockSpec((TCo, TPd), lambda i, j: (i, j))),
        compiler_params=pltpu.CompilerParams(
            dimension_semantics=("parallel", "parallel"),
            vmem_limit_bytes=vmem_limit),
    )(*args)

    out = out2d[:, :N * P].reshape(Cout, N, Ho, Wo)
    return jnp.transpose(out, (1, 0, 2, 3))


def conv2d_halo(x, w, bias, shift, *, stride, pad, leaky, th,
                out_dtype=jnp.bfloat16):
    """Conv (+LeakyReLU +folded BN) with in-kernel halo-band im2col.

    The input is never duplicated in HBM: each grid step DMAs a haloed band of
    TH output rows and builds the tap matrix inside the kernel."""
    assert stride in (1, 2)
    x_in, w_in, b_in, s_in = x, w, bias, shift
    N, Cin, H, W = x.shape
    Cout, _, KH, KW = w.shape
    Ho = (H + 2 * pad - KH) // stride + 1
    Wo = (W + 2 * pad - KW) // stride + 1
    P = Ho * Wo
    KK = KH * KW
    K = KK * Cin
    TP = th * Wo
    nb = Ho // th

    xb = x.astype(jnp.bfloat16)
    xp = jnp.pad(xb, ((0, 0), (0, 0), (pad, pad), (pad, pad)))
    Hp, Wp = H + 2 * pad, W + 2 * pad

    if stride == 1:
        x_prep = xp                                   # (N, Cin, Hp, Wp)
        c_eff, w_eff = Cin, Wp
        rband = th + KH - 1
        tap_offsets = [(0, kh, kw) for kh in range(KH) for kw in range(KW)]
    else:
        # Even/odd (row, col) deinterleave -> 4 parity planes as extra channels,
        # so the kernel only ever needs contiguous (stride-1) slices.
        hq = Ho + (KH - 1) // 2
        wq = Wo + (KW - 1) // 2
        xp = jnp.pad(xp, ((0, 0), (0, 0),
                          (0, max(0, 2 * hq - Hp)), (0, max(0, 2 * wq - Wp))))
        planes = [xp[:, :, pr:pr + 2 * hq:2, pc:pc + 2 * wq:2]
                  for pr in range(2) for pc in range(2)]
        x_prep = jnp.concatenate(planes, axis=1)      # (N, 4*Cin, hq, wq)
        c_eff, w_eff = 4 * Cin, wq
        rband = th + (KH - 1) // 2
        tap_offsets = [(((kh % 2) * 2 + (kw % 2)) * Cin, kh // 2, kw // 2)
                       for kh in range(KH) for kw in range(KW)]

    w2d = jnp.transpose(w, (0, 2, 3, 1)).reshape(Cout, K).astype(jnp.bfloat16)
    b2 = bias.reshape(Cout, 1).astype(jnp.float32)
    args = [x_prep, w2d, b2]
    has_shift = shift is not None
    if has_shift:
        args.append(shift.reshape(Cout, 1).astype(jnp.float32))

    kernel = functools.partial(_halo_conv_kernel, tap_offsets=tuple(tap_offsets),
                               cin=Cin, th=th, wo=Wo, leaky=leaky,
                               has_shift=has_shift)

    in_specs = [pl.BlockSpec(memory_space=pl.ANY),
                _resident_spec((Cout, K), lambda n, b: (0, 0)),
                _resident_spec((Cout, 1), lambda n, b: (0, 0))]
    if has_shift:
        in_specs.append(_resident_spec((Cout, 1), lambda n, b: (0, 0)))

    out_bytes = jnp.dtype(out_dtype).itemsize
    est = (c_eff * rband * w_eff * 2          # band scratch
           + K * TP * 2                       # taps scratch
           + 2 * Cout * K * 2                 # weight (worst case double-buffer)
           + 8 * Cout * 4                     # bias / shift
           + 2 * Cout * TP * out_bytes        # output double buffer
           + Cout * TP * 4)                   # f32 accumulator
    vmem_limit = min(int(est * 1.5) + (4 << 20), 64 << 20)

    try:
        out = pl.pallas_call(
            kernel,
            out_shape=jax.ShapeDtypeStruct((N, Cout, P), out_dtype),
            grid_spec=pltpu.PrefetchScalarGridSpec(
                num_scalar_prefetch=0,
                grid=(N, nb),
                in_specs=in_specs,
                out_specs=pl.BlockSpec((1, Cout, TP), lambda n, b: (n, 0, b)),
                scratch_shapes=[pltpu.VMEM((c_eff, rband, w_eff), jnp.bfloat16),
                                pltpu.VMEM((K, TP), jnp.bfloat16)]),
            compiler_params=pltpu.CompilerParams(
                dimension_semantics=("parallel", "parallel"),
                vmem_limit_bytes=vmem_limit),
        )(*args)
    except Exception:
        # TODO(synk): safety net only -- if this Pallas build rejects the manual
        # halo-DMA / scratch-assembly pattern, fall back to the lane-dense dense
        # matmul path so the forward pass still runs.
        return conv2d_dense(x_in, w_in, b_in, s_in, stride=stride, pad=pad,
                            leaky=leaky, sigmoid=False, out_dtype=out_dtype)

    return out.reshape(N, Cout, Ho, Wo)


# ------------------------------ model params ------------------------------- #
def make_discriminator_params(key, num_channel=1, base_filter=8):
    """Synthetic params: conv weights ~ N(0, 0.02), biases zero (weight_init);
    BatchNorm at PyTorch defaults, folded into conv weight/bias (inference)."""
    bf = base_filter
    # (Cin, Cout, K, stride, pad, leaky, has_bn)
    cfg = [
        (num_channel, bf,     3, 1, 1, True,  False),  # conv1
        (bf,          bf,     3, 2, 1, True,  True),   # conv2 + bn2
        (bf,          2 * bf, 3, 1, 1, True,  True),   # conv3 + bn3
        (2 * bf,      2 * bf, 3, 2, 1, True,  True),   # conv4 + bn4
        (2 * bf,      4 * bf, 3, 1, 1, True,  True),   # conv5 + bn5
        (4 * bf,      4 * bf, 3, 2, 1, True,  True),   # conv6 + bn6
        (4 * bf,      8 * bf, 3, 1, 1, True,  True),   # conv7 + bn7
        (8 * bf,      8 * bf, 3, 2, 1, True,  True),   # conv8 + bn8
        (8 * bf, num_channel, 4, 1, 0, False, False),  # conv9
    ]
    eps = 1e-5
    layers = []
    keys = jax.random.split(key, len(cfg))
    for k, (cin, cout, ks, st, pad, leaky, has_bn) in zip(keys, cfg):
        w = 0.02 * jax.random.normal(k, (cout, cin, ks, ks), dtype=jnp.float32)
        b = jnp.zeros((cout,), jnp.float32)
        if has_bn:
            gamma = jnp.ones((cout,), jnp.float32)
            beta = jnp.zeros((cout,), jnp.float32)
            running_mean = jnp.zeros((cout,), jnp.float32)
            running_var = jnp.ones((cout,), jnp.float32)
            scale = gamma / jnp.sqrt(running_var + eps)
            shift = beta - running_mean * scale
            # Fold BN scale into the conv.  Valid only for scale > 0 (LeakyReLU
            # is positively homogeneous); trained checkpoints with negative
            # gamma would need a sign-split instead of this fold.
            assert bool(jnp.all(scale > 0)), "BN scale fold requires scale > 0"
            w = w * scale[:, None, None, None]
            b = b * scale
        else:
            shift = None
        layers.append(dict(w=w, b=b, shift=shift, stride=st, pad=pad, leaky=leaky))
    # TODO(synk): fc1/fc2 from __init__ are unused in forward() -> not lowered.
    return layers


# ------------------------------ forward pass ------------------------------- #
def discriminator_forward(params, x_nchw):
    x = x_nchw        # cast to bf16 happens once inside the first conv wrapper
    fused_sigmoid = False
    n_layers = len(params)
    for i, layer in enumerate(params):
        is_last = i == n_layers - 1
        out_dtype = jnp.float32 if is_last else jnp.bfloat16
        N, Cin, H, W = x.shape
        Cout, _, KH, KW = layer["w"].shape
        stride, pad = layer["stride"], layer["pad"]
        Ho = (H + 2 * pad - KH) // stride + 1
        Wo = (W + 2 * pad - KW) // stride + 1
        P = Ho * Wo
        th = _pick_band_rows(Ho, Wo, Cout, KH * KW * Cin)
        if P >= 1024 and stride in (1, 2) and th is not None:
            x = conv2d_halo(x, layer["w"], layer["b"], layer["shift"],
                            stride=stride, pad=pad, leaky=layer["leaky"],
                            th=th, out_dtype=out_dtype)
            fused_sigmoid = False
        else:
            fused_sigmoid = is_last and P == 1
            x = conv2d_dense(x, layer["w"], layer["b"], layer["shift"],
                             stride=stride, pad=pad, leaky=layer["leaky"],
                             sigmoid=fused_sigmoid, out_dtype=out_dtype)
    if fused_sigmoid:
        # conv9 output is 1x1 -> global avg-pool is the identity and the
        # sigmoid was fused into the kernel epilogue.
        return x.reshape(x.shape[0], x.shape[1])
    # Generic tail for non-1x1 conv9 outputs (tiny XLA glue).
    pooled = x.astype(jnp.float32).mean(axis=(2, 3))
    return jax.nn.sigmoid(pooled)


# ---------------------------------- main ----------------------------------- #
if __name__ == "__main__":
    num_channel = 1
    base_filter = 8          # small synthetic width (module default is 64)
    N, H, W = 2, 64, 64      # H=W=64 -> 4x4 before conv9 (4x4 kernel, pad 0)

    key = jax.random.PRNGKey(0)
    pkey, xkey = jax.random.split(key)
    params = make_discriminator_params(pkey, num_channel, base_filter)
    x = jax.random.normal(xkey, (N, num_channel, H, W), dtype=jnp.float32)

    out = discriminator_forward(params, x)
    out = jax.block_until_ready(out)
    assert out.shape == (N, num_channel), out.shape
    assert bool(jnp.all(jnp.isfinite(out)))
    print("KERNEL_OK")
</pallas_src>

<mosaic_0001>
module attributes {stable_mosaic.version = 11 : i64} {
  func.func @_halo_conv_kernel(%arg0: i32, %arg1: i32, %arg2: memref<2x1x66x66xbf16, #tpu.memory_space<any>>, %arg3: memref<8x9xbf16, #tpu.memory_space<vmem>>, %arg4: memref<8x1xf32, #tpu.memory_space<vmem>>, %arg5: memref<1x8x1024xbf16, #tpu.memory_space<vmem>>, %arg6: memref<1x18x66xbf16, #tpu.memory_space<vmem>>, %arg7: memref<9x1024xbf16, #tpu.memory_space<vmem>>) attributes {dimension_semantics = [#tpu.dimension_semantics<parallel>, #tpu.dimension_semantics<parallel>], iteration_bounds = array<i64: 2, 4>, scalar_prefetch = 0 : i64, scratch_operands = 2 : i64, tpu.core_type = #tpu.core_type<tc>, window_params = [{}, {pipeline_mode = #tpu.pipeline_mode<synchronous>, transform_indices = @transform_1, window_bounds = array<i64: 8, 9>}, {pipeline_mode = #tpu.pipeline_mode<synchronous>, transform_indices = @transform_2, window_bounds = array<i64: 8, 1>}, {transform_indices = @transform_3, window_bounds = array<i64: 1, 8, 1024>}]} {
    %c16_i32 = arith.constant 16 : i32
    %0 = arith.muli %arg1, %c16_i32 : i32
    %1 = tpu.assume_multiple %0, 16 : i32
    "tpu.region"() ({
      %449 = tpu.sem_alloc : memref<!tpu.dma_semaphore, #tpu.memory_space<semaphore_mem>>
      %c0_i32 = arith.constant 0 : i32
      %c0_i32_698 = arith.constant 0 : i32
      %450 = tpu.memref_slice %arg2[%arg0, %c0_i32, %1, %c0_i32_698] : memref<2x1x66x66xbf16, #tpu.memory_space<any>> -> memref<1x1x18x66xbf16, #tpu.memory_space<any>>
      %451 = tpu.memref_squeeze %450 : memref<1x1x18x66xbf16, #tpu.memory_space<any>> -> memref<1x18x66xbf16, #tpu.memory_space<any>>
      tpu.enqueue_dma source(%451 : memref<1x18x66xbf16, #tpu.memory_space<any>>) target(%arg6 : memref<1x18x66xbf16, #tpu.memory_space<vmem>>) target_semaphore(%449 : memref<!tpu.dma_semaphore, #tpu.memory_space<semaphore_mem>>)
      %c0_i32_699 = arith.constant 0 : i32
      %c0_i32_700 = arith.constant 0 : i32
      %452 = tpu.memref_slice %arg2[%arg0, %c0_i32_699, %1, %c0_i32_700] : memref<2x1x66x66xbf16, #tpu.memory_space<any>> -> memref<1x1x18x66xbf16, #tpu.memory_space<any>>
      %453 = tpu.memref_squeeze %452 : memref<1x1x18x66xbf16, #tpu.memory_space<any>> -> memref<1x18x66xbf16, #tpu.memory_space<any>>
      tpu.wait_dma2 semaphore(%449 : memref<!tpu.dma_semaphore, #tpu.memory_space<semaphore_mem>>) src(%453 : memref<1x18x66xbf16, #tpu.memory_space<any>>) dst(%arg6 : memref<1x18x66xbf16, #tpu.memory_space<vmem>>)
      tpu.yield
    }) : () -> ()
    %c0 = arith.constant 0 : index
    %c0_0 = arith.constant 0 : index
    %c0_1 = arith.constant 0 : index
    %2 = vector.load %arg6[%c0, %c0_0, %c0_1] : memref<1x18x66xbf16, #tpu.memory_space<vmem>>, vector<1x1x64xbf16>
    %3 = vector.shape_cast %2 : vector<1x1x64xbf16> to vector<1x64xbf16>
    %c0_2 = arith.constant 0 : index
    %c0_3 = arith.constant 0 : index
    %4 = vector.load %arg7[%c0_2, %c0_3] : memref<9x1024xbf16, #tpu.memory_space<vmem>>, vector<1x64xbf16>
    tpu.vector_store %arg7[%c0_2, %c0_3], %3 {strides = array<i32>} : memref<9x1024xbf16, #tpu.memory_space<vmem>>, vector<1x64xbf16>,
    %c0_4 = arith.constant 0 : index
    %c1 = arith.constant 1 : index
    %c0_5 = arith.constant 0 : index
    %5 = vector.load %arg6[%c0_4, %c1, %c0_5] : memref<1x18x66xbf16, #tpu.memory_space<vmem>>, vector<1x1x64xbf16>
    %6 = vector.shape_cast %5 : vector<1x1x64xbf16> to vector<1x64xbf16>
    %c0_6 = arith.constant 0 : index
    %c64 = arith.constant 64 : index
    %7 = vector.load %arg7[%c0_6, %c64] : memref<9x1024xbf16, #tpu.memory_space<vmem>>, vector<1x64xbf16>
    tpu.vector_store %arg7[%c0_6, %c64], %6 {strides = array<i32>} : memref<9x1024xbf16, #tpu.memory_space<vmem>>, vector<1x64xbf16>,
    %c0_7 = arith.constant 0 : index
    %c2 = arith.constant 2 : index
    %c0_8 = arith.constant 0 : index
    %8 = vector.load %arg6[%c0_7, %c2, %c0_8] : memref<1x18x66xbf16, #tpu.memory_space<vmem>>, vector<1x1x64xbf16>
    %9 = vector.shape_cast %8 : vector<1x1x64xbf16> to vector<1x64xbf16>
    %c0_9 = arith.constant 0 : index
    %c128 = arith.constant 128 : index
    %10 = vector.load %arg7[%c0_9, %c128] : memref<9x1024xbf16, #tpu.memory_space<vmem>>, vector<1x64xbf16>
    tpu.vector_store %arg7[%c0_9, %c128], %9 {strides = array<i32>} : memref<9x1024xbf16, #tpu.memory_space<vmem>>, vector<1x64xbf16>,
    %c0_10 = arith.constant 0 : index
    %c3 = arith.constant 3 : index
    %c0_11 = arith.constant 0 : index
    %11 = vector.load %arg6[%c0_10, %c3, %c0_11] : memref<1x18x66xbf16, #tpu.memory_space<vmem>>, vector<1x1x64xbf16>
    %12 = vector.shape_cast %11 : vector<1x1x64xbf16> to vector<1x64xbf16>
    %c0_12 = arith.constant 0 : index
    %c192 = arith.constant 192 : index
    %13 = vector.load %arg7[%c0_12, %c192] : memref<9x1024xbf16, #tpu.memory_space<vmem>>, vector<1x64xbf16>
    tpu.vector_store %arg7[%c0_12, %c192], %12 {strides = array<i32>} : memref<9x1024xbf16, #tpu.memory_space<vmem>>, vector<1x64xbf16>,
    %c0_13 = arith.constant 0 : index
    %c4 = arith.constant 4 : index
    %c0_14 = arith.constant 0 : index
    %14 = vector.load %arg6[%c0_13, %c4, %c0_14] : memref<1x18x66xbf16, #tpu.memory_space<vmem>>, vector<1x1x64xbf16>
    %15 = vector.shape_cast %14 : vector<1x1x64xbf16> to vector<1x64xbf16>
    %c0_15 = arith.constant 0 : index
    %c256 = arith.constant 256 : index
    %16 = vector.load %arg7[%c0_15, %c256] : memref<9x1024xbf16, #tpu.memory_space<vmem>>, vector<1x64xbf16>
    tpu.vector_store %arg7[%c0_15, %c256], %15 {strides = array<i32>} : memref<9x1024xbf16, #tpu.memory_space<vmem>>, vector<1x64xbf16>,
    %c0_16 = arith.constant 0 : index
    %c5 = arith.constant 5 : index
    %c0_17 = arith.constant 0 : index
    %17 = vector.load %arg6[%c0_16, %c5, %c0_17] : memref<1x18x66xbf16, #tpu.memory_space<vmem>>, vector<1x1x64xbf16>
    %18 = vector.shape_cast %17 : vector<1x1x64xbf16> to vector<1x64xbf16>
    %c0_18 = arith.constant 0 : index
    %c320 = arith.constant 320 : index
    %19 = vector.load %arg7[%c0_18, %c320] : memref<9x1024xbf16, #tpu.memory_space<vmem>>, vector<1x64xbf16>
    tpu.vector_store %arg7[%c0_18, %c320], %18 {strides = array<i32>} : memref<9x1024xbf16, #tpu.memory_space<vmem>>, vector<1x64xbf16>,
    %c0_19 = arith.constant 0 : index
    %c6 = arith.constant 6 : index
    %c0_20 = arith.constant 0 : index
    %20 = vector.load %arg6[%c0_19, %c6, %c0_20] : memref<1x18x66xbf16, #tpu.memory_space<vmem>>, vector<1x1x64xbf16>
    %21 = vector.shape_cast %20 : vector<1x1x64xbf16> to vector<1x64xbf16>
    %c0_21 = arith.constant 0 : index
    %c384 = arith.constant 384 : index
    %22 = vector.load %arg7[%c0_21, %c384] : memref<9x1024xbf16, #tpu.memory_space<vmem>>, vector<1x64xbf16>
    tpu.vector_store %arg7[%c0_21, %c384], %21 {strides = array<i32>} : memref<9x1024xbf16, #tpu.memory_space<vmem>>, vector<1x64xbf16>,
    %c0_22 = arith.constant 0 : index
    %c7 = arith.constant 7 : index
    %c0_23 = arith.constant 0 : index
    %23 = vector.load %arg6[%c0_22, %c7, %c0_23] : memref<1x18x66xbf16, #tpu.memory_space<vmem>>, vector<1x1x64xbf16>
    %24 = vector.shape_cast %23 : vector<1x1x64xbf16> to vector<1x64xbf16>
    %c0_24 = arith.constant 0 : index
    %c448 = arith.constant 448 : index
    %25 = vector.load %arg7[%c0_24, %c448] : memref<9x1024xbf16, #tpu.memory_space<vmem>>, vector<1x64xbf16>
    tpu.vector_store %arg7[%c0_24, %c448], %24 {strides = array<i32>} : memref<9x1024xbf16, #tpu.memory_space<vmem>>, vector<1x64xbf16>,
    %c0_25 = arith.constant 0 : index
    %c8 = arith.constant 8 : index
    %c0_26 = arith.constant 0 : index
    %26 = vector.load %arg6[%c0_25, %c8, %c0_26] : memref<1x18x66xbf16, #tpu.memory_space<vmem>>, vector<1x1x64xbf16>
    %27 = vector.shape_cast %26 : vector<1x1x64xbf16> to vector<1x64xbf16>
    %c0_27 = arith.constant 0 : index
    %c512 = arith.constant 512 : index
    %28 = vector.load %arg7[%c0_27, %c512] : memref<9x1024xbf16, #tpu.memory_space<vmem>>, vector<1x64xbf16>
    tpu.vector_store %arg7[%c0_27, %c512], %27 {strides = array<i32>} : memref<9x1024xbf16, #tpu.memory_space<vmem>>, vector<1x64xbf16>,
    %c0_28 = arith.constant 0 : index
    %c9 = arith.constant 9 : index
    %c0_29 = arith.constant 0 : index
    %29 = vector.load %arg6[%c0_28, %c9, %c0_29] : memref<1x18x66xbf16, #tpu.memory_space<vmem>>, vector<1x1x64xbf16>
    %30 = vector.shape_cast %29 : vector<1x1x64xbf16> to vector<1x64xbf16>
    %c0_30 = arith.constant 0 : index
    %c576 = arith.constant 576 : index
    %31 = vector.load %arg7[%c0_30, %c576] : memref<9x1024xbf16, #tpu.memory_space<vmem>>, vector<1x64xbf16>
    tpu.vector_store %arg7[%c0_30, %c576], %30 {strides = array<i32>} : memref<9x1024xbf16, #tpu.memory_space<vmem>>, vector<1x64xbf16>,
    %c0_31 = arith.constant 0 : index
    %c10 = arith.constant 10 : index
    %c0_32 = arith.constant 0 : index
    %32 = vector.load %arg6[%c0_31, %c10, %c0_32] : memref<1x18x66xbf16, #tpu.memory_space<vmem>>, vector<1x1x64xbf16>
    %33 = vector.shape_cast %32 : vector<1x1x64xbf16> to vector<1x64xbf16>
    %c0_33 = arith.constant 0 : index
    %c640 = arith.constant 640 : index
    %34 = vector.load %arg7[%c0_33, %c640] : memref<9x1024xbf16, #tpu.memory_space<vmem>>, vector<1x64xbf16>
    tpu.vector_store %arg7[%c0_33, %c640], %33 {strides = array<i32>} : memref<9x1024xbf16, #tpu.memory_space<vmem>>, vector<1x64xbf16>,
    %c0_34 = arith.constant 0 : index
    %c11 = arith.constant 11 : index
    %c0_35 = arith.constant 0 : index
    %35 = vector.load %arg6[%c0_34, %c11, %c0_35] : memref<1x18x66xbf16, #tpu.memory_space<vmem>>, vector<1x1x64xbf16>
    %36 = vector.shape_cast %35 : vector<1x1x64xbf16> to vector<1x64xbf16>
    %c0_36 = arith.constant 0 : index
    %c704 = arith.constant 704 : index
    %37 = vector.load %arg7[%c0_36, %c704] : memref<9x1024xbf16, #tpu.memory_space<vmem>>, vector<1x64xbf16>
    tpu.vector_store %arg7[%c0_36, %c704], %36 {strides = array<i32>} : memref<9x1024xbf16, #tpu.memory_space<vmem>>, vector<1x64xbf16>,
    %c0_37 = arith.constant 0 : index
    %c12 = arith.constant 12 : index
    %c0_38 = arith.constant 0 : index
    %38 = vector.load %arg6[%c0_37, %c12, %c0_38] : memref<1x18x66xbf16, #tpu.memory_space<vmem>>, vector<1x1x64xbf16>
    %39 = vector.shape_cast %38 : vector<1x1x64xbf16> to vector<1x64xbf16>
    %c0_39 = arith.constant 0 : index
    %c768 = arith.constant 768 : index
    %40 = vector.load %arg7[%c0_39, %c768] : memref<9x1024xbf16, #tpu.memory_space<vmem>>, vector<1x64xbf16>
    tpu.vector_store %arg7[%c0_39, %c768], %39 {strides = array<i32>} : memref<9x1024xbf16, #tpu.memory_space<vmem>>, vector<1x64xbf16>,
    %c0_40 = arith.constant 0 : index
    %c13 = arith.constant 13 : index
    %c0_41 = arith.constant 0 : index
    %41 = vector.load %arg6[%c0_40, %c13, %c0_41] : memref<1x18x66xbf16, #tpu.memory_space<vmem>>, vector<1x1x64xbf16>
    %42 = vector.shape_cast %41 : vector<1x1x64xbf16> to vector<1x64xbf16>
    %c0_42 = arith.constant 0 : index
    %c832 = arith.constant 832 : index
    %43 = vector.load %arg7[%c0_42, %c832] : memref<9x1024xbf16, #tpu.memory_space<vmem>>, vector<1x64xbf16>
    tpu.vector_store %arg7[%c0_42, %c832], %42 {strides = array<i32>} : memref<9x1024xbf16, #tpu.memory_space<vmem>>, vector<1x64xbf16>,
    %c0_43 = arith.constant 0 : index
    %c14 = arith.constant 14 : index
    %c0_44 = arith.constant 0 : index
    %44 = vector.load %arg6[%c0_43, %c14, %c0_44] : memref<1x18x66xbf16, #tpu.memory_space<vmem>>, vector<1x1x64xbf16>
    %45 = vector.shape_cast %44 : vector<1x1x64xbf16> to vector<1x64xbf16>
    %c0_45 = arith.constant 0 : index
    %c896 = arith.constant 896 : index
    %46 = vector.load %arg7[%c0_45, %c896] : memref<9x1024xbf16, #tpu.memory_space<vmem>>, vector<1x64xbf16>
    tpu.vector_store %arg7[%c0_45, %c896], %45 {strides = array<i32>} : memref<9x1024xbf16, #tpu.memory_space<vmem>>, vector<1x64xbf16>,
    %c0_46 = arith.constant 0 : index
    %c15 = arith.constant 15 : index
    %c0_47 = arith.constant 0 : index
    %47 = vector.load %arg6[%c0_46, %c15, %c0_47] : memref<1x18x66xbf16, #tpu.memory_space<vmem>>, vector<1x1x64xbf16>
    %48 = vector.shape_cast %47 : vector<1x1x64xbf16> to vector<1x64xbf16>
    %c0_48 = arith.constant 0 : index
    %c960 = arith.constant 960 : index
    %49 = vector.load %arg7[%c0_48, %c960] : memref<9x1024xbf16, #tpu.memory_space<vmem>>, vector<1x64xbf16>
    tpu.vector_store %arg7[%c0_48, %c960], %48 {strides = array<i32>} : memref<9x1024xbf16, #tpu.memory_space<vmem>>, vector<1x64xbf16>,
    %c0_49 = arith.constant 0 : index
    %c0_50 = arith.constant 0 : index
    %c1_51 = arith.constant 1 : index
    %50 = vector.load %arg6[%c0_49, %c0_50, %c1_51] : memref<1x18x66xbf16, #tpu.memory_space<vmem>>, vector<1x1x64xbf16>
    %51 = vector.shape_cast %50 : vector<1x1x64xbf16> to vector<1x64xbf16>
    %c1_52 = arith.constant 1 : index
    %c0_53 = arith.constant 0 : index
    %52 = vector.load %arg7[%c1_52, %c0_53] : memref<9x1024xbf16, #tpu.memory_space<vmem>>, vector<1x64xbf16>
    tpu.vector_store %arg7[%c1_52, %c0_53], %51 {strides = array<i32>} : memref<9x1024xbf16, #tpu.memory_space<vmem>>, vector<1x64xbf16>,
    %c0_54 = arith.constant 0 : index
    %c1_55 = arith.constant 1 : index
    %c1_56 = arith.constant 1 : index
    %53 = vector.load %arg6[%c0_54, %c1_55, %c1_56] : memref<1x18x66xbf16, #tpu.memory_space<vmem>>, vector<1x1x64xbf16>
    %54 = vector.shape_cast %53 : vector<1x1x64xbf16> to vector<1x64xbf16>
    %c1_57 = arith.constant 1 : index
    %c64_58 = arith.constant 64 : index
    %55 = vector.load %arg7[%c1_57, %c64_58] : memref<9x1024xbf16, #tpu.memory_space<vmem>>, vector<1x64xbf16>
    tpu.vector_store %arg7[%c1_57, %c64_58], %54 {strides = array<i32>} : memref<9x1024xbf16, #tpu.memory_space<vmem>>, vector<1x64xbf16>,
    %c0_59 = arith.constant 0 : index
    %c2_60 = arith.constant 2 : index
    %c1_61 = arith.constant 1 : index
    %56 = vector.load %arg6[%c0_59, %c2_60, %c1_61] : memref<1x18x66xbf16, #tpu.memory_space<vmem>>, vector<1x1x64xbf16>
    %57 = vector.shape_cast %56 : vector<1x1x64xbf16> to vector<1x64xbf16>
    %c1_62 = arith.constant 1 : index
    %c128_63 = arith.constant 128 : index
    %58 = vector.load %arg7[%c1_62, %c128_63] : memref<9x1024xbf16, #tpu.memory_space<vmem>>, vector<1x64xbf16>
    tpu.vector_store %arg7[%c1_62, %c128_63], %57 {strides = array<i32>} : memref<9x1024xbf16, #tpu.memory_space<vmem>>, vector<1x64xbf16>,
    %c0_64 = arith.constant 0 : index
    %c3_65 = arith.constant 3 : index
    %c1_66 = arith.constant 1 : index
    %59 = vector.load %arg6[%c0_64, %c3_65, %c1_66] : memref<1x18x66xbf16, #tpu.memory_space<vmem>>, vector<1x1x64xbf16>
    %60 = vector.shape_cast %59 : vector<1x1x64xbf16> to vector<1x64xbf16>
    %c1_67 = arith.constant 1 : index
    %c192_68 = arith.constant 192 : index
    %61 = vector.load %arg7[%c1_67, %c192_68] : memref<9x1024xbf16, #tpu.memory_space<vmem>>, vector<1x64xbf16>
    tpu.vector_store %arg7[%c1_67, %c192_68], %60 {strides = array<i32>} : memref<9x1024xbf16, #tpu.memory_space<vmem>>, vector<1x64xbf16>,
    %c0_69 = arith.constant 0 : index
    %c4_70 = arith.constant 4 : index
    %c1_71 = arith.constant 1 : index
    %62 = vector.load %arg6[%c0_69, %c4_70, %c1_71] : memref<1x18x66xbf16, #tpu.memory_space<vmem>>, vector<1x1x64xbf16>
    %63 = vector.shape_cast %62 : vector<1x1x64xbf16> to vector<1x64xbf16>
    %c1_72 = arith.constant 1 : index
    %c256_73 = arith.constant 256 : index
    %64 = vector.load %arg7[%c1_72, %c256_73] : memref<9x1024xbf16, #tpu.memory_space<vmem>>, vector<1x64xbf16>
    tpu.vector_store %arg7[%c1_72, %c256_73], %63 {strides = array<i32>} : memref<9x1024xbf16, #tpu.memory_space<vmem>>, vector<1x64xbf16>,
    %c0_74 = arith.constant 0 : index
    %c5_75 = arith.constant 5 : index
    %c1_76 = arith.constant 1 : index
    %65 = vector.load %arg6[%c0_74, %c5_75, %c1_76] : memref<1x18x66xbf16, #tpu.memory_space<vmem>>, vector<1x1x64xbf16>
    %66 = vector.shape_cast %65 : vector<1x1x64xbf16> to vector<1x64xbf16>
    %c1_77 = arith.constant 1 : index
    %c320_78 = arith.constant 320 : index
    %67 = vector.load %arg7[%c1_77, %c320_78] : memref<9x1024xbf16, #tpu.memory_space<vmem>>, vector<1x64xbf16>
    tpu.vector_store %arg7[%c1_77, %c320_78], %66 {strides = array<i32>} : memref<9x1024xbf16, #tpu.memory_space<vmem>>, vector<1x64xbf16>,
    %c0_79 = arith.constant 0 : index
    %c6_80 = arith.constant 6 : index
    %c1_81 = arith.constant 1 : index
    %68 = vector.load %arg6[%c0_79, %c6_80, %c1_81] : memref<1x18x66xbf16, #tpu.memory_space<vmem>>, vector<1x1x64xbf16>
    %69 = vector.shape_cast %68 : vector<1x1x64xbf16> to vector<1x64xbf16>
    %c1_82 = arith.constant 1 : index
    %c384_83 = arith.constant 384 : index
    %70 = vector.load %arg7[%c1_82, %c384_83] : memref<9x1024xbf16, #tpu.memory_space<vmem>>, vector<1x64xbf16>
    tpu.vector_store %arg7[%c1_82, %c384_83], %69 {strides = array<i32>} : memref<9x1024xbf16, #tpu.memory_space<vmem>>, vector<1x64xbf16>,
    %c0_84 = arith.constant 0 : index
    %c7_85 = arith.constant 7 : index
    %c1_86 = arith.constant 1 : index
    %71 = vector.load %arg6[%c0_84, %c7_85, %c1_86] : memref<1x18x66xbf16, #tpu.memory_space<vmem>>, vector<1x1x64xbf16>
    %72 = vector.shape_cast %71 : vector<1x1x64xbf16> to vector<1x64xbf16>
    %c1_87 = arith.constant 1 : index
    %c448_88 = arith.constant 448 : index
    %73 = vector.load %arg7[%c1_87, %c448_88] : memref<9x1024xbf16, #tpu.memory_space<vmem>>, vector<1x64xbf16>
    tpu.vector_store %arg7[%c1_87, %c448_88], %72 {strides = array<i32>} : memref<9x1024xbf16, #tpu.memory_space<vmem>>, vector<1x64xbf16>,
    %c0_89 = arith.constant 0 : index
    %c8_90 = arith.constant 8 : index
    %c1_91 = arith.constant 1 : index
    %74 = vector.load %arg6[%c0_89, %c8_90, %c1_91] : memref<1x18x66xbf16, #tpu.memory_space<vmem>>, vector<1x1x64xbf16>
    %75 = vector.shape_cast %74 : vector<1x1x64xbf16> to vector<1x64xbf16>
    %c1_92 = arith.constant 1 : index
    %c512_93 = arith.constant 512 : index
    %76 = vector.load %arg7[%c1_92, %c512_93] : memref<9x1024xbf16, #tpu.memory_space<vmem>>, vector<1x64xbf16>
    tpu.vector_store %arg7[%c1_92, %c512_93], %75 {strides = array<i32>} : memref<9x1024xbf16, #tpu.memory_space<vmem>>, vector<1x64xbf16>,
    %c0_94 = arith.constant 0 : index
    %c9_95 = arith.constant 9 : index
    %c1_96 = arith.constant 1 : index
    %77 = vector.load %arg6[%c0_94, %c9_95, %c1_96] : memref<1x18x66xbf16, #tpu.memory_space<vmem>>, vector<1x1x64xbf16>
    %78 = vector.shape_cast %77 : vector<1x1x64xbf16> to vector<1x64xbf16>
    %c1_97 = arith.constant 1 : index
    %c576_98 = arith.constant 576 : index
    %79 = vector.load %arg7[%c1_97, %c576_98] : memref<9x1024xbf16, #tpu.memory_space<vmem>>, vector<1x64xbf16>
    tpu.vector_store %arg7[%c1_97, %c576_98], %78 {strides = array<i32>} : memref<9x1024xbf16, #tpu.memory_space<vmem>>, vector<1x64xbf16>,
    %c0_99 = arith.constant 0 : index
    %c10_100 = arith.constant 10 : index
    %c1_101 = arith.constant 1 : index
    %80 = vector.load %arg6[%c0_99, %c10_100, %c1_101] : memref<1x18x66xbf16, #tpu.memory_space<vmem>>, vector<1x1x64xbf16>
    %81 = vector.shape_cast %80 : vector<1x1x64xbf16> to vector<1x64xbf16>
    %c1_102 = arith.constant 1 : index
    %c640_103 = arith.constant 640 : index
    %82 = vector.load %arg7[%c1_102, %c640_103] : memref<9x1024xbf16, #tpu.memory_space<vmem>>, vector<1x64xbf16>
    tpu.vector_store %arg7[%c1_102, %c640_103], %81 {strides = array<i32>} : memref<9x1024xbf16, #tpu.memory_space<vmem>>, vector<1x64xbf16>,
    %c0_104 = arith.constant 0 : index
    %c11_105 = arith.constant 11 : index
    %c1_106 = arith.constant 1 : index
    %83 = vector.load %arg6[%c0_104, %c11_105, %c1_106] : memref<1x18x66xbf16, #tpu.memory_space<vmem>>, vector<1x1x64xbf16>
    %84 = vector.shape_cast %83 : vector<1x1x64xbf16> to vector<1x64xbf16>
    %c1_107 = arith.constant 1 : index
    %c704_108 = arith.constant 704 : index
    %85 = vector.load %arg7[%c1_107, %c704_108] : memref<9x1024xbf16, #tpu.memory_space<vmem>>, vector<1x64xbf16>
    tpu.vector_store %arg7[%c1_107, %c704_108], %84 {strides = array<i32>} : memref<9x1024xbf16, #tpu.memory_space<vmem>>, vector<1x64xbf16>,
    %c0_109 = arith.constant 0 : index
    %c12_110 = arith.constant 12 : index
    %c1_111 = arith.constant 1 : index
    %86 = vector.load %arg6[%c0_109, %c12_110, %c1_111] : memref<1x18x66xbf16, #tpu.memory_space<vmem>>, vector<1x1x64xbf16>
    %87 = vector.shape_cast %86 : vector<1x1x64xbf16> to vector<1x64xbf16>
    %c1_112 = arith.constant 1 : index
    %c768_113 = arith.constant 768 : index
    %88 = vector.load %arg7[%c1_112, %c768_113] : memref<9x1024xbf16, #tpu.memory_space<vmem>>, vector<1x64xbf16>
    tpu.vector_store %arg7[%c1_112, %c768_113], %87 {strides = array<i32>} : memref<9x1024xbf16, #tpu.memory_space<vmem>>, vector<1x64xbf16>,
    %c0_114 = arith.constant 0 : index
    %c13_115 = arith.constant 13 : index
    %c1_116 = arith.constant 1 : index
    %89 = vector.load %arg6[%c0_114, %c13_115, %c1_116] : memref<1x18x66xbf16, #tpu.memory_space<vmem>>, vector<1x1x64xbf16>
    %90 = vector.shape_cast %89 : vector<1x1x64xbf16> to vector<1x64xbf16>
    %c1_117 = arith.constant 1 : index
    %c832_118 = arith.constant 832 : index
    %91 = vector.load %arg7[%c1_117, %c832_118] : memref<9x1024xbf16, #tpu.memory_space<vmem>>, vector<1x64xbf16>
    tpu.vector_store %arg7[%c1_117, %c832_118], %90 {strides = array<i32>} : memref<9x1024xbf16, #tpu.memory_space<vmem>>, vector<1x64xbf16>,
    %c0_119 = arith.constant 0 : index
    %c14_120 = arith.constant 14 : index
    %c1_121 = arith.constant 1 : index
    %92 = vector.load %arg6[%c0_119, %c14_120, %c1_121] : memref<1x18x66xbf16, #tpu.memory_space<vmem>>, vector<1x1x64xbf16>
    %93 = vector.shape_cast %92 : vector<1x1x64xbf16> to vector<1x64xbf16>
    %c1_122 = arith.constant 1 : index
    %c896_123 = arith.constant 896 : index
    %94 = vector.load %arg7[%c1_122, %c896_123] : memref<9x1024xbf16, #tpu.memory_space<vmem>>, vector<1x64xbf16>
    tpu.vector_store %arg7[%c1_122, %c896_123], %93 {strides = array<i32>} : memref<9x1024xbf16, #tpu.memory_space<vmem>>, vector<1x64xbf16>,
    %c0_124 = arith.constant 0 : index
    %c15_125 = arith.constant 15 : index
    %c1_126 = arith.constant 1 : index
    %95 = vector.load %arg6[%c0_124, %c15_125, %c1_126] : memref<1x18x66xbf16, #tpu.memory_space<vmem>>, vector<1x1x64xbf16>
    %96 = vector.shape_cast %95 : vector<1x1x64xbf16> to vector<1x64xbf16>
    %c1_127 = arith.constant 1 : index
    %c960_128 = arith.constant 960 : index
    %97 = vector.load %arg7[%c1_127, %c960_128] : memref<9x1024xbf16, #tpu.memory_space<vmem>>, vector<1x64xbf16>
    tpu.vector_store %arg7[%c1_127, %c960_128], %96 {strides = array<i32>} : memref<9x1024xbf16, #tpu.memory_space<vmem>>, vector<1x64xbf16>,
    %c0_129 = arith.constant 0 : index
    %c0_130 = arith.constant 0 : index
    %c2_131 = arith.constant 2 : index
    %98 = vector.load %arg6[%c0_129, %c0_130, %c2_131] : memref<1x18x66xbf16, #tpu.memory_space<vmem>>, vector<1x1x64xbf16>
    %99 = vector.shape_cast %98 : vector<1x1x64xbf16> to vector<1x64xbf16>
    %c2_132 = arith.constant 2 : index
    %c0_133 = arith.constant 0 : index
    %100 = vector.load %arg7[%c2_132, %c0_133] : memref<9x1024xbf16, #tpu.memory_space<vmem>>, vector<1x64xbf16>
    tpu.vector_store %arg7[%c2_132, %c0_133], %99 {strides = array<i32>} : memref<9x1024xbf16, #tpu.memory_space<vmem>>, vector<1x64xbf16>,
    %c0_134 = arith.constant 0 : index
    %c1_135 = arith.constant 1 : index
    %c2_136 = arith.constant 2 : index
    %101 = vector.load %arg6[%c0_134, %c1_135, %c2_136] : memref<1x18x66xbf16, #tpu.memory_space<vmem>>, vector<1x1x64xbf16>
    %102 = vector.shape_cast %101 : vector<1x1x64xbf16> to vector<1x64xbf16>
    %c2_137 = arith.constant 2 : index
    %c64_138 = arith.constant 64 : index
    %103 = vector.load %arg7[%c2_137, %c64_138] : memref<9x1024xbf16, #tpu.memory_space<vmem>>, vector<1x64xbf16>
    tpu.vector_store %arg7[%c2_137, %c64_138], %102 {strides = array<i32>} : memref<9x1024xbf16, #tpu.memory_space<vmem>>, vector<1x64xbf16>,
    %c0_139 = arith.constant 0 : index
    %c2_140 = arith.constant 2 : index
    %c2_141 = arith.constant 2 : index
    %104 = vector.load %arg6[%c0_139, %c2_140, %c2_141] : memref<1x18x66xbf16, #tpu.memory_space<vmem>>, vector<1x1x64xbf16>
    %105 = vector.shape_cast %104 : vector<1x1x64xbf16> to vector<1x64xbf16>
    %c2_142 = arith.constant 2 : index
    %c128_143 = arith.constant 128 : index
    %106 = vector.load %arg7[%c2_142, %c128_143] : memref<9x1024xbf16, #tpu.memory_space<vmem>>, vector<1x64xbf16>
    tpu.vector_store %arg7[%c2_142, %c128_143], %105 {strides = array<i32>} : memref<9x1024xbf16, #tpu.memory_space<vmem>>, vector<1x64xbf16>,
    %c0_144 = arith.constant 0 : index
    %c3_145 = arith.constant 3 : index
    %c2_146 = arith.constant 2 : index
    %107 = vector.load %arg6[%c0_144, %c3_145, %c2_146] : memref<1x18x66xbf16, #tpu.memory_space<vmem>>, vector<1x1x64xbf16>
    %108 = vector.shape_cast %107 : vector<1x1x64xbf16> to vector<1x64xbf16>
    %c2_147 = arith.constant 2 : index
    %c192_148 = arith.constant 192 : index
    %109 = vector.load %arg7[%c2_147, %c192_148] : memref<9x1024xbf16, #tpu.memory_space<vmem>>, vector<1x64xbf16>
    tpu.vector_store %arg7[%c2_147, %c192_148], %108 {strides = array<i32>} : memref<9x1024xbf16, #tpu.memory_space<vmem>>, vector<1x64xbf16>,
    %c0_149 = arith.constant 0 : index
    %c4_150 = arith.constant 4 : index
    %c2_151 = arith.constant 2 : index
    %110 = vector.load %arg6[%c0_149, %c4_150, %c2_151] : memref<1x18x66xbf16, #tpu.memory_space<vmem>>, vector<1x1x64xbf16>
    %111 = vector.shape_cast %110 : vector<1x1x64xbf16> to vector<1x64xbf16>
    %c2_152 = arith.constant 2 : index
    %c256_153 = arith.constant 256 : index
    %112 = vector.load %arg7[%c2_152, %c256_153] : memref<9x1024xbf16, #tpu.memory_space<vmem>>, vector<1x64xbf16>
    tpu.vector_store %arg7[%c2_152, %c256_153], %111 {strides = array<i32>} : memref<9x1024xbf16, #tpu.memory_space<vmem>>, vector<1x64xbf16>,
    %c0_154 = arith.constant 0 : index
    %c5_155 = arith.constant 5 : index
    %c2_156 = arith.constant 2 : index
    %113 = vector.load %arg6[%c0_154, %c5_155, %c2_156] : memref<1x18x66xbf16, #tpu.memory_space<vmem>>, vector<1x1x64xbf16>
    %114 = vector.shape_cast %113 : vector<1x1x64xbf16> to vector<1x64xbf16>
    %c2_157 = arith.constant 2 : index
    %c320_158 = arith.constant 320 : index
    %115 = vector.load %arg7[%c2_157, %c320_158] : memref<9x1024xbf16, #tpu.memory_space<vmem>>, vector<1x64xbf16>
    tpu.vector_store %arg7[%c2_157, %c320_158], %114 {strides = array<i32>} : memref<9x1024xbf16, #tpu.memory_space<vmem>>, vector<1x64xbf16>,
    %c0_159 = arith.constant 0 : index
    %c6_160 = arith.constant 6 : index
    %c2_161 = arith.constant 2 : index
    %116 = vector.load %arg6[%c0_159, %c6_160, %c2_161] : memref<1x18x66xbf16, #tpu.memory_space<vmem>>, vector<1x1x64xbf16>
    %117 = vector.shape_cast %116 : vector<1x1x64xbf16> to vector<1x64xbf16>
    %c2_162 = arith.constant 2 : index
    %c384_163 = arith.constant 384 : index
    %118 = vector.load %arg7[%c2_162, %c384_163] : memref<9x1024xbf16, #tpu.memory_space<vmem>>, vector<1x64xbf16>
    tpu.vector_store %arg7[%c2_162, %c384_163], %117 {strides = array<i32>} : memref<9x1024xbf16, #tpu.memory_space<vmem>>, vector<1x64xbf16>,
    %c0_164 = arith.constant 0 : index
    %c7_165 = arith.constant 7 : index
    %c2_166 = arith.constant 2 : index
    %119 = vector.load %arg6[%c0_164, %c7_165, %c2_166] : memref<1x18x66xbf16, #tpu.memory_space<vmem>>, vector<1x1x64xbf16>
    %120 = vector.shape_cast %119 : vector<1x1x64xbf16> to vector<1x64xbf16>
    %c2_167 = arith.constant 2 : index
    %c448_168 = arith.constant 448 : index
    %121 = vector.load %arg7[%c2_167, %c448_168] : memref<9x1024xbf16, #tpu.memory_space<vmem>>, vector<1x64xbf16>
    tpu.vector_store %arg7[%c2_167, %c448_168], %120 {strides = array<i32>} : memref<9x1024xbf16, #tpu.memory_space<vmem>>, vector<1x64xbf16>,
    %c0_169 = arith.constant 0 : index
    %c8_170 = arith.constant 8 : index
    %c2_171 = arith.constant 2 : index
    %122 = vector.load %arg6[%c0_169, %c8_170, %c2_171] : memref<1x18x66xbf16, #tpu.memory_space<vmem>>, vector<1x1x64xbf16>
    %123 = vector.shape_cast %122 : vector<1x1x64xbf16> to vector<1x64xbf16>
    %c2_172 = arith.constant 2 : index
    %c512_173 = arith.constant 512 : index
    %124 = vector.load %arg7[%c2_172, %c512_173] : memref<9x1024xbf16, #tpu.memory_space<vmem>>, vector<1x64xbf16>
    tpu.vector_store %arg7[%c2_172, %c512_173], %123 {strides = array<i32>} : memref<9x1024xbf16, #tpu.memory_space<vmem>>, vector<1x64xbf16>,
    %c0_174 = arith.constant 0 : index
    %c9_175 = arith.constant 9 : index
    %c2_176 = arith.constant 2 : index
    %125 = vector.load %arg6[%c0_174, %c9_175, %c2_176] : memref<1x18x66xbf16, #tpu.memory_space<vmem>>, vector<1x1x64xbf16>
    %126 = vector.shape_cast %125 : vector<1x1x64xbf16> to vector<1x64xbf16>
    %c2_177 = arith.constant 2 : index
    %c576_178 = arith.constant 576 : index
    %127 = vector.load %arg7[%c2_177, %c576_178] : memref<9x1024xbf16, #tpu.memory_space<vmem>>, vector<1x64xbf16>
    tpu.vector_store %arg7[%c2_177, %c576_178], %126 {strides = array<i32>} : memref<9x1024xbf16, #tpu.memory_space<vmem>>, vector<1x64xbf16>,
    %c0_179 = arith.constant 0 : index
    %c10_180 = arith.constant 10 : index
    %c2_181 = arith.constant 2 : index
    %128 = vector.load %arg6[%c0_179, %c10_180, %c2_181] : memref<1x18x66xbf16, #tpu.memory_space<vmem>>, vector<1x1x64xbf16>
    %129 = vector.shape_cast %128 : vector<1x1x64xbf16> to vector<1x64xbf16>
    %c2_182 = arith.constant 2 : index
    %c640_183 = arith.constant 640 : index
    %130 = vector.load %arg7[%c2_182, %c640_183] : memref<9x1024xbf16, #tpu.memory_space<vmem>>, vector<1x64xbf16>
    tpu.vector_store %arg7[%c2_182, %c640_183], %129 {strides = array<i32>} : memref<9x1024xbf16, #tpu.memory_space<vmem>>, vector<1x64xbf16>,
    %c0_184 = arith.constant 0 : index
    %c11_185 = arith.constant 11 : index
    %c2_186 = arith.constant 2 : index
    %131 = vector.load %arg6[%c0_184, %c11_185, %c2_186] : memref<1x18x66xbf16, #tpu.memory_space<vmem>>, vector<1x1x64xbf16>
    %132 = vector.shape_cast %131 : vector<1x1x64xbf16> to vector<1x64xbf16>
    %c2_187 = arith.constant 2 : index
    %c704_188 = arith.constant 704 : index
    %133 = vector.load %arg7[%c2_187, %c704_188] : memref<9x1024xbf16, #tpu.memory_space<vmem>>, vector<1x64xbf16>
    tpu.vector_store %arg7[%c2_187, %c704_188], %132 {strides = array<i32>} : memref<9x1024xbf16, #tpu.memory_space<vmem>>, vector<1x64xbf16>,
    %c0_189 = arith.constant 0 : index
    %c12_190 = arith.constant 12 : index
    %c2_191 = arith.constant 2 : index
    %134 = vector.load %arg6[%c0_189, %c12_190, %c2_191] : memref<1x18x66xbf16, #tpu.memory_space<vmem>>, vector<1x1x64xbf16>
    %135 = vector.shape_cast %134 : vector<1x1x64xbf16> to vector<1x64xbf16>
    %c2_192 = arith.constant 2 : index
    %c768_193 = arith.constant 768 : index
    %136 = vector.load %arg7[%c2_192, %c768_193] : memref<9x1024xbf16, #tpu.memory_space<vmem>>, vector<1x64xbf16>
    tpu.vector_store %arg7[%c2_192, %c768_193], %135 {strides = array<i32>} : memref<9x1024xbf16, #tpu.memory_space<vmem>>, vector<1x64xbf16>,
    %c0_194 = arith.constant 0 : index
    %c13_195 = arith.constant 13 : index
    %c2_196 = arith.constant 2 : index
    %137 = vector.load %arg6[%c0_194, %c13_195, %c2_196] : memref<1x18x66xbf16, #tpu.memory_space<vmem>>, vector<1x1x64xbf16>
    %138 = vector.shape_cast %137 : vector<1x1x64xbf16> to vector<1x64xbf16>
    %c2_197 = arith.constant 2 : index
    %c832_198 = arith.constant 832 : index
    %139 = vector.load %arg7[%c2_197, %c832_198] : memref<9x1024xbf16, #tpu.memory_space<vmem>>, vector<1x64xbf16>
    tpu.vector_store %arg7[%c2_197, %c832_198], %138 {strides = array<i32>} : memref<9x1024xbf16, #tpu.memory_space<vmem>>, vector<1x64xbf16>,
    %c0_199 = arith.constant 0 : index
    %c14_200 = arith.constant 14 : index
    %c2_201 = arith.constant 2 : index
    %140 = vector.load %arg6[%c0_199, %c14_200, %c2_201] : memref<1x18x66xbf16, #tpu.memory_space<vmem>>, vector<1x1x64xbf16>
    %141 = vector.shape_cast %140 : vector<1x1x64xbf16> to vector<1x64xbf16>
    %c2_202 = arith.constant 2 : index
    %c896_203 = arith.constant 896 : index
    %142 = vector.load %arg7[%c2_202, %c896_203] : memref<9x1024xbf16, #tpu.memory_space<vmem>>, vector<1x64xbf16>
    tpu.vector_store %arg7[%c2_202, %c896_203], %141 {strides = array<i32>} : memref<9x1024xbf16, #tpu.memory_space<vmem>>, vector<1x64xbf16>,
    %c0_204 = arith.constant 0 : index
    %c15_205 = arith.constant 15 : index
    %c2_206 = arith.constant 2 : index
    %143 = vector.load %arg6[%c0_204, %c15_205, %c2_206] : memref<1x18x66xbf16, #tpu.memory_space<vmem>>, vector<1x1x64xbf16>
    %144 = vector.shape_cast %143 : vector<1x1x64xbf16> to vector<1x64xbf16>
    %c2_207 = arith.constant 2 : index
    %c960_208 = arith.constant 960 : index
    %145 = vector.load %arg7[%c2_207, %c960_208] : memref<9x1024xbf16, #tpu.memory_space<vmem>>, vector<1x64xbf16>
    tpu.vector_store %arg7[%c2_207, %c960_208], %144 {strides = array<i32>} : memref<9x1024xbf16, #tpu.memory_space<vmem>>, vector<1x64xbf16>,
    %c0_209 = arith.constant 0 : index
    %c1_210 = arith.constant 1 : index
    %c0_211 = arith.constant 0 : index
    %146 = vector.load %arg6[%c0_209, %c1_210, %c0_211] : memref<1x18x66xbf16, #tpu.memory_space<vmem>>, vector<1x1x64xbf16>
    %147 = vector.shape_cast %146 : vector<1x1x64xbf16> to vector<1x64xbf16>
    %c3_212 = arith.constant 3 : index
    %c0_213 = arith.constant 0 : index
    %148 = vector.load %arg7[%c3_212, %c0_213] : memref<9x1024xbf16, #tpu.memory_space<vmem>>, vector<1x64xbf16>
    tpu.vector_store %arg7[%c3_212, %c0_213], %147 {strides = array<i32>} : memref<9x1024xbf16, #tpu.memory_space<vmem>>, vector<1x64xbf16>,
    %c0_214 = arith.constant 0 : index
    %c2_215 = arith.constant 2 : index
    %c0_216 = arith.constant 0 : index
    %149 = vector.load %arg6[%c0_214, %c2_215, %c0_216] : memref<1x18x66xbf16, #tpu.memory_space<vmem>>, vector<1x1x64xbf16>
    %150 = vector.shape_cast %149 : vector<1x1x64xbf16> to vector<1x64xbf16>
    %c3_217 = arith.constant 3 : index
    %c64_218 = arith.constant 64 : index
    %151 = vector.load %arg7[%c3_217, %c64_218] : memref<9x1024xbf16, #tpu.memory_space<vmem>>, vector<1x64xbf16>
    tpu.vector_store %arg7[%c3_217, %c64_218], %150 {strides = array<i32>} : memref<9x1024xbf16, #tpu.memory_space<vmem>>, vector<1x64xbf16>,
    %c0_219 = arith.constant 0 : index
    %c3_220 = arith.constant 3 : index
    %c0_221 = arith.constant 0 : index
    %152 = vector.load %arg6[%c0_219, %c3_220, %c0_221] : memref<1x18x66xbf16, #tpu.memory_space<vmem>>, vector<1x1x64xbf16>
    %153 = vector.shape_cast %152 : vector<1x1x64xbf16> to vector<1x64xbf16>
    %c3_222 = arith.constant 3 : index
    %c128_223 = arith.constant 128 : index
    %154 = vector.load %arg7[%c3_222, %c128_223] : memref<9x1024xbf16, #tpu.memory_space<vmem>>, vector<1x64xbf16>
    tpu.vector_store %arg7[%c3_222, %c128_223], %153 {strides = array<i32>} : memref<9x1024xbf16, #tpu.memory_space<vmem>>, vector<1x64xbf16>,
    %c0_224 = arith.constant 0 : index
    %c4_225 = arith.constant 4 : index
    %c0_226 = arith.constant 0 : index
    %155 = vector.load %arg6[%c0_224, %c4_225, %c0_226] : memref<1x18x66xbf16, #tpu.memory_space<vmem>>, vector<1x1x64xbf16>
    %156 = vector.shape_cast %155 : vector<1x1x64xbf16> to vector<1x64xbf16>
    %c3_227 = arith.constant 3 : index
    %c192_228 = arith.constant 192 : index
    %157 = vector.load %arg7[%c3_227, %c192_228] : memref<9x1024xbf16, #tpu.memory_space<vmem>>, vector<1x64xbf16>
    tpu.vector_store %arg7[%c3_227, %c192_228], %156 {strides = array<i32>} : memref<9x1024xbf16, #tpu.memory_space<vmem>>, vector<1x64xbf16>,
    %c0_229 = arith.constant 0 : index
    %c5_230 = arith.constant 5 : index
    %c0_231 = arith.constant 0 : index
    %158 = vector.load %arg6[%c0_229, %c5_230, %c0_231] : memref<1x18x66xbf16, #tpu.memory_space<vmem>>, vector<1x1x64xbf16>
    %159 = vector.shape_cast %158 : vector<1x1x64xbf16> to vector<1x64xbf16>
    %c3_232 = arith.constant 3 : index
    %c256_233 = arith.constant 256 : index
    %160 = vector.load %arg7[%c3_232, %c256_233] : memref<9x1024xbf16, #tpu.memory_space<vmem>>, vector<1x64xbf16>
    tpu.vector_store %arg7[%c3_232, %c256_233], %159 {strides = array<i32>} : memref<9x1024xbf16, #tpu.memory_space<vmem>>, vector<1x64xbf16>,
    %c0_234 = arith.constant 0 : index
    %c6_235 = arith.constant 6 : index
    %c0_236 = arith.constant 0 : index
    %161 = vector.load %arg6[%c0_234, %c6_235, %c0_236] : memref<1x18x66xbf16, #tpu.memory_space<vmem>>, vector<1x1x64xbf16>
    %162 = vector.shape_cast %161 : vector<1x1x64xbf16> to vector<1x64xbf16>
    %c3_237 = arith.constant 3 : index
    %c320_238 = arith.constant 320 : index
    %163 = vector.load %arg7[%c3_237, %c320_238] : memref<9x1024xbf16, #tpu.memory_space<vmem>>, vector<1x64xbf16>
    tpu.vector_store %arg7[%c3_237, %c320_238], %162 {strides = array<i32>} : memref<9x1024xbf16, #tpu.memory_space<vmem>>, vector<1x64xbf16>,
    %c0_239 = arith.constant 0 : index
    %c7_240 = arith.constant 7 : index
    %c0_241 = arith.constant 0 : index
    %164 = vector.load %arg6[%c0_239, %c7_240, %c0_241] : memref<1x18x66xbf16, #tpu.memory_space<vmem>>, vector<1x1x64xbf16>
    %165 = vector.shape_cast %164 : vector<1x1x64xbf16> to vector<1x64xbf16>
    %c3_242 = arith.constant 3 : index
    %c384_243 = arith.constant 384 : index
    %166 = vector.load %arg7[%c3_242, %c384_243] : memref<9x1024xbf16, #tpu.memory_space<vmem>>, vector<1x64xbf16>
    tpu.vector_store %arg7[%c3_242, %c384_243], %165 {strides = array<i32>} : memref<9x1024xbf16, #tpu.memory_space<vmem>>, vector<1x64xbf16>,
    %c0_244 = arith.constant 0 : index
    %c8_245 = arith.constant 8 : index
    %c0_246 = arith.constant 0 : index
    %167 = vector.load %arg6[%c0_244, %c8_245, %c0_246] : memref<1x18x66xbf16, #tpu.memory_space<vmem>>, vector<1x1x64xbf16>
    %168 = vector.shape_cast %167 : vector<1x1x64xbf16> to vector<1x64xbf16>
    %c3_247 = arith.constant 3 : index
    %c448_248 = arith.constant 448 : index
    %169 = vector.load %arg7[%c3_247, %c448_248] : memref<9x1024xbf16, #tpu.memory_space<vmem>>, vector<1x64xbf16>
    tpu.vector_store %arg7[%c3_247, %c448_248], %168 {strides = array<i32>} : memref<9x1024xbf16, #tpu.memory_space<vmem>>, vector<1x64xbf16>,
    %c0_249 = arith.constant 0 : index
    %c9_250 = arith.constant 9 : index
    %c0_251 = arith.constant 0 : index
    %170 = vector.load %arg6[%c0_249, %c9_250, %c0_251] : memref<1x18x66xbf16, #tpu.memory_space<vmem>>, vector<1x1x64xbf16>
    %171 = vector.shape_cast %170 : vector<1x1x64xbf16> to vector<1x64xbf16>
    %c3_252 = arith.constant 3 : index
    %c512_253 = arith.constant 512 : index
    %172 = vector.load %arg7[%c3_252, %c512_253] : memref<9x1024xbf16, #tpu.memory_space<vmem>>, vector<1x64xbf16>
    tpu.vector_store %arg7[%c3_252, %c512_253], %171 {strides = array<i32>} : memref<9x1024xbf16, #tpu.memory_space<vmem>>, vector<1x64xbf16>,
    %c0_254 = arith.constant 0 : index
    %c10_255 = arith.constant 10 : index
    %c0_256 = arith.constant 0 : index
    %173 = vector.load %arg6[%c0_254, %c10_255, %c0_256] : memref<1x18x66xbf16, #tpu.memory_space<vmem>>, vector<1x1x64xbf16>
    %174 = vector.shape_cast %173 : vector<1x1x64xbf16> to vector<1x64xbf16>
    %c3_257 = arith.constant 3 : index
    %c576_258 = arith.constant 576 : index
    %175 = vector.load %arg7[%c3_257, %c576_258] : memref<9x1024xbf16, #tpu.memory_space<vmem>>, vector<1x64xbf16>
    tpu.vector_store %arg7[%c3_257, %c576_258], %174 {strides = array<i32>} : memref<9x1024xbf16, #tpu.memory_space<vmem>>, vector<1x64xbf16>,
    %c0_259 = arith.constant 0 : index
    %c11_260 = arith.constant 11 : index
    %c0_261 = arith.constant 0 : index
    %176 = vector.load %arg6[%c0_259, %c11_260, %c0_261] : memref<1x18x66xbf16, #tpu.memory_space<vmem>>, vector<1x1x64xbf16>
    %177 = vector.shape_cast %176 : vector<1x1x64xbf16> to vector<1x64xbf16>
    %c3_262 = arith.constant 3 : index
    %c640_263 = arith.constant 640 : index
    %178 = vector.load %arg7[%c3_262, %c640_263] : memref<9x1024xbf16, #tpu.memory_space<vmem>>, vector<1x64xbf16>
    tpu.vector_store %arg7[%c3_262, %c640_263], %177 {strides = array<i32>} : memref<9x1024xbf16, #tpu.memory_space<vmem>>, vector<1x64xbf16>,
    %c0_264 = arith.constant 0 : index
    %c12_265 = arith.constant 12 : index
    %c0_266 = arith.constant 0 : index
    %179 = vector.load %arg6[%c0_264, %c12_265, %c0_266] : memref<1x18x66xbf16, #tpu.memory_space<vmem>>, vector<1x1x64xbf16>
    %180 = vector.shape_cast %179 : vector<1x1x64xbf16> to vector<1x64xbf16>
    %c3_267 = arith.constant 3 : index
    %c704_268 = arith.constant 704 : index
    %181 = vector.load %arg7[%c3_267, %c704_268] : memref<9x1024xbf16, #tpu.memory_space<vmem>>, vector<1x64xbf16>
    tpu.vector_store %arg7[%c3_267, %c704_268], %180 {strides = array<i32>} : memref<9x1024xbf16, #tpu.memory_space<vmem>>, vector<1x64xbf16>,
    %c0_269 = arith.constant 0 : index
    %c13_270 = arith.constant 13 : index
    %c0_271 = arith.constant 0 : index
    %182 = vector.load %arg6[%c0_269, %c13_270, %c0_271] : memref<1x18x66xbf16, #tpu.memory_space<vmem>>, vector<1x1x64xbf16>
    %183 = vector.shape_cast %182 : vector<1x1x64xbf16> to vector<1x64xbf16>
    %c3_272 = arith.constant 3 : index
    %c768_273 = arith.constant 768 : index
    %184 = vector.load %arg7[%c3_272, %c768_273] : memref<9x1024xbf16, #tpu.memory_space<vmem>>, vector<1x64xbf16>
    tpu.vector_store %arg7[%c3_272, %c768_273], %183 {strides = array<i32>} : memref<9x1024xbf16, #tpu.memory_space<vmem>>, vector<1x64xbf16>,
    %c0_274 = arith.constant 0 : index
    %c14_275 = arith.constant 14 : index
    %c0_276 = arith.constant 0 : index
    %185 = vector.load %arg6[%c0_274, %c14_275, %c0_276] : memref<1x18x66xbf16, #tpu.memory_space<vmem>>, vector<1x1x64xbf16>
    %186 = vector.shape_cast %185 : vector<1x1x64xbf16> to vector<1x64xbf16>
    %c3_277 = arith.constant 3 : index
    %c832_278 = arith.constant 832 : index
    %187 = vector.load %arg7[%c3_277, %c832_278] : memref<9x1024xbf16, #tpu.memory_space<vmem>>, vector<1x64xbf16>
    tpu.vector_store %arg7[%c3_277, %c832_278], %186 {strides = array<i32>} : memref<9x1024xbf16, #tpu.memory_space<vmem>>, vector<1x64xbf16>,
    %c0_279 = arith.constant 0 : index
    %c15_280 = arith.constant 15 : index
    %c0_281 = arith.constant 0 : index
    %188 = vector.load %arg6[%c0_279, %c15_280, %c0_281] : memref<1x18x66xbf16, #tpu.memory_space<vmem>>, vector<1x1x64xbf16>
    %189 = vector.shape_cast %188 : vector<1x1x64xbf16> to vector<1x64xbf16>
    %c3_282 = arith.constant 3 : index
    %c896_283 = arith.constant 896 : index
    %190 = vector.load %arg7[%c3_282, %c896_283] : memref<9x1024xbf16, #tpu.memory_space<vmem>>, vector<1x64xbf16>
    tpu.vector_store %arg7[%c3_282, %c896_283], %189 {strides = array<i32>} : memref<9x1024xbf16, #tpu.memory_space<vmem>>, vector<1x64xbf16>,
    %c0_284 = arith.constant 0 : index
    %c16 = arith.constant 16 : index
    %c0_285 = arith.constant 0 : index
    %191 = vector.load %arg6[%c0_284, %c16, %c0_285] : memref<1x18x66xbf16, #tpu.memory_space<vmem>>, vector<1x1x64xbf16>
    %192 = vector.shape_cast %191 : vector<1x1x64xbf16> to vector<1x64xbf16>
    %c3_286 = arith.constant 3 : index
    %c960_287 = arith.constant 960 : index
    %193 = vector.load %arg7[%c3_286, %c960_287] : memref<9x1024xbf16, #tpu.memory_space<vmem>>, vector<1x64xbf16>
    tpu.vector_store %arg7[%c3_286, %c960_287], %192 {strides = array<i32>} : memref<9x1024xbf16, #tpu.memory_space<vmem>>, vector<1x64xbf16>,
    %c0_288 = arith.constant 0 : index
    %c1_289 = arith.constant 1 : index
    %c1_290 = arith.constant 1 : index
    %194 = vector.load %arg6[%c0_288, %c1_289, %c1_290] : memref<1x18x66xbf16, #tpu.memory_space<vmem>>, vector<1x1x64xbf16>
    %195 = vector.shape_cast %194 : vector<1x1x64xbf16> to vector<1x64xbf16>
    %c4_291 = arith.constant 4 : index
    %c0_292 = arith.constant 0 : index
    %196 = vector.load %arg7[%c4_291, %c0_292] : memref<9x1024xbf16, #tpu.memory_space<vmem>>, vector<1x64xbf16>
    tpu.vector_store %arg7[%c4_291, %c0_292], %195 {strides = array<i32>} : memref<9x1024xbf16, #tpu.memory_space<vmem>>, vector<1x64xbf16>,
    %c0_293 = arith.constant 0 : index
    %c2_294 = arith.constant 2 : index
    %c1_295 = arith.constant 1 : index
    %197 = vector.load %arg6[%c0_293, %c2_294, %c1_295] : memref<1x18x66xbf16, #tpu.memory_space<vmem>>, vector<1x1x64xbf16>
    %198 = vector.shape_cast %197 : vector<1x1x64xbf16> to vector<1x64xbf16>
    %c4_296 = arith.constant 4 : index
    %c64_297 = arith.constant 64 : index
    %199 = vector.load %arg7[%c4_296, %c64_297] : memref<9x1024xbf16, #tpu.memory_space<vmem>>, vector<1x64xbf16>
    tpu.vector_store %arg7[%c4_296, %c64_297], %198 {strides = array<i32>} : memref<9x1024xbf16, #tpu.memory_space<vmem>>, vector<1x64xbf16>,
    %c0_298 = arith.constant 0 : index
    %c3_299 = arith.constant 3 : index
    %c1_300 = arith.constant 1 : index
    %200 = vector.load %arg6[%c0_298, %c3_299, %c1_300] : memref<1x18x66xbf16, #tpu.memory_space<vmem>>, vector<1x1x64xbf16>
    %201 = vector.shape_cast %200 : vector<1x1x64xbf16> to vector<1x64xbf16>
    %c4_301 = arith.constant 4 : index
    %c128_302 = arith.constant 128 : index
    %202 = vector.load %arg7[%c4_301, %c128_302] : memref<9x1024xbf16, #tpu.memory_space<vmem>>, vector<1x64xbf16>
    tpu.vector_store %arg7[%c4_301, %c128_302], %201 {strides = array<i32>} : memref<9x1024xbf16, #tpu.memory_space<vmem>>, vector<1x64xbf16>,
    %c0_303 = arith.constant 0 : index
    %c4_304 = arith.constant 4 : index
    %c1_305 = arith.constant 1 : index
    %203 = vector.load %arg6[%c0_303, %c4_304, %c1_305] : memref<1x18x66xbf16, #tpu.memory_space<vmem>>, vector<1x1x64xbf16>
    %204 = vector.shape_cast %203 : vector<1x1x64xbf16> to vector<1x64xbf16>
    %c4_306 = arith.constant 4 : index
    %c192_307 = arith.constant 192 : index
    %205 = vector.load %arg7[%c4_306, %c192_307] : memref<9x1024xbf16, #tpu.memory_space<vmem>>, vector<1x64xbf16>
    tpu.vector_store %arg7[%c4_306, %c192_307], %204 {strides = array<i32>} : memref<9x1024xbf16, #tpu.memory_space<vmem>>, vector<1x64xbf16>,
    %c0_308 = arith.constant 0 : index
    %c5_309 = arith.constant 5 : index
    %c1_310 = arith.constant 1 : index
    %206 = vector.load %arg6[%c0_308, %c5_309, %c1_310] : memref<1x18x66xbf16, #tpu.memory_space<vmem>>, vector<1x1x64xbf16>
    %207 = vector.shape_cast %206 : vector<1x1x64xbf16> to vector<1x64xbf16>
    %c4_311 = arith.constant 4 : index
    %c256_312 = arith.constant 256 : index
    %208 = vector.load %arg7[%c4_311, %c256_312] : memref<9x1024xbf16, #tpu.memory_space<vmem>>, vector<1x64xbf16>
    tpu.vector_store %arg7[%c4_311, %c256_312], %207 {strides = array<i32>} : memref<9x1024xbf16, #tpu.memory_space<vmem>>, vector<1x64xbf16>,
    %c0_313 = arith.constant 0 : index
    %c6_314 = arith.constant 6 : index
    %c1_315 = arith.constant 1 : index
    %209 = vector.load %arg6[%c0_313, %c6_314, %c1_315] : memref<1x18x66xbf16, #tpu.memory_space<vmem>>, vector<1x1x64xbf16>
    %210 = vector.shape_cast %209 : vector<1x1x64xbf16> to vector<1x64xbf16>
    %c4_316 = arith.constant 4 : index
    %c320_317 = arith.constant 320 : index
    %211 = vector.load %arg7[%c4_316, %c320_317] : memref<9x1024xbf16, #tpu.memory_space<vmem>>, vector<1x64xbf16>
    tpu.vector_store %arg7[%c4_316, %c320_317], %210 {strides = array<i32>} : memref<9x1024xbf16, #tpu.memory_space<vmem>>, vector<1x64xbf16>,
    %c0_318 = arith.constant 0 : index
    %c7_319 = arith.constant 7 : index
    %c1_320 = arith.constant 1 : index
    %212 = vector.load %arg6[%c0_318, %c7_319, %c1_320] : memref<1x18x66xbf16, #tpu.memory_space<vmem>>, vector<1x1x64xbf16>
    %213 = vector.shape_cast %212 : vector<1x1x64xbf16> to vector<1x64xbf16>
    %c4_321 = arith.constant 4 : index
    %c384_322 = arith.constant 384 : index
    %214 = vector.load %arg7[%c4_321, %c384_322] : memref<9x1024xbf16, #tpu.memory_space<vmem>>, vector<1x64xbf16>
    tpu.vector_store %arg7[%c4_321, %c384_322], %213 {strides = array<i32>} : memref<9x1024xbf16, #tpu.memory_space<vmem>>, vector<1x64xbf16>,
    %c0_323 = arith.constant 0 : index
    %c8_324 = arith.constant 8 : index
    %c1_325 = arith.constant 1 : index
    %215 = vector.load %arg6[%c0_323, %c8_324, %c1_325] : memref<1x18x66xbf16, #tpu.memory_space<vmem>>, vector<1x1x64xbf16>
    %216 = vector.shape_cast %215 : vector<1x1x64xbf16> to vector<1x64xbf16>
    %c4_326 = arith.constant 4 : index
    %c448_327 = arith.constant 448 : index
    %217 = vector.load %arg7[%c4_326, %c448_327] : memref<9x1024xbf16, #tpu.memory_space<vmem>>, vector<1x64xbf16>
    tpu.vector_store %arg7[%c4_326, %c448_327], %216 {strides = array<i32>} : memref<9x1024xbf16, #tpu.memory_space<vmem>>, vector<1x64xbf16>,
    %c0_328 = arith.constant 0 : index
    %c9_329 = arith.constant 9 : index
    %c1_330 = arith.constant 1 : index
    %218 = vector.load %arg6[%c0_328, %c9_329, %c1_330] : memref<1x18x66xbf16, #tpu.memory_space<vmem>>, vector<1x1x64xbf16>
    %219 = vector.shape_cast %218 : vector<1x1x64xbf16> to vector<1x64xbf16>
    %c4_331 = arith.constant 4 : index
    %c512_332 = arith.constant 512 : index
    %220 = vector.load %arg7[%c4_331, %c512_332] : memref<9x1024xbf16, #tpu.memory_space<vmem>>, vector<1x64xbf16>
    tpu.vector_store %arg7[%c4_331, %c512_332], %219 {strides = array<i32>} : memref<9x1024xbf16, #tpu.memory_space<vmem>>, vector<1x64xbf16>,
    %c0_333 = arith.constant 0 : index
    %c10_334 = arith.constant 10 : index
    %c1_335 = arith.constant 1 : index
    %221 = vector.load %arg6[%c0_333, %c10_334, %c1_335] : memref<1x18x66xbf16, #tpu.memory_space<vmem>>, vector<1x1x64xbf16>
    %222 = vector.shape_cast %221 : vector<1x1x64xbf16> to vector<1x64xbf16>
    %c4_336 = arith.constant 4 : index
    %c576_337 = arith.constant 576 : index
    %223 = vector.load %arg7[%c4_336, %c576_337] : memref<9x1024xbf16, #tpu.memory_space<vmem>>, vector<1x64xbf16>
    tpu.vector_store %arg7[%c4_336, %c576_337], %222 {strides = array<i32>} : memref<9x1024xbf16, #tpu.memory_space<vmem>>, vector<1x64xbf16>,
    %c0_338 = arith.constant 0 : index
    %c11_339 = arith.constant 11 : index
    %c1_340 = arith.constant 1 : index
    %224 = vector.load %arg6[%c0_338, %c11_339, %c1_340] : memref<1x18x66xbf16, #tpu.memory_space<vmem>>, vector<1x1x64xbf16>
    %225 = vector.shape_cast %224 : vector<1x1x64xbf16> to vector<1x64xbf16>
    %c4_341 = arith.constant 4 : index
    %c640_342 = arith.constant 640 : index
    %226 = vector.load %arg7[%c4_341, %c640_342] : memref<9x1024xbf16, #tpu.memory_space<vmem>>, vector<1x64xbf16>
    tpu.vector_store %arg7[%c4_341, %c640_342], %225 {strides = array<i32>} : memref<9x1024xbf16, #tpu.memory_space<vmem>>, vector<1x64xbf16>,
    %c0_343 = arith.constant 0 : index
    %c12_344 = arith.constant 12 : index
    %c1_345 = arith.constant 1 : index
    %227 = vector.load %arg6[%c0_343, %c12_344, %c1_345] : memref<1x18x66xbf16, #tpu.memory_space<vmem>>, vector<1x1x64xbf16>
    %228 = vector.shape_cast %227 : vector<1x1x64xbf16> to vector<1x64xbf16>
    %c4_346 = arith.constant 4 : index
    %c704_347 = arith.constant 704 : index
    %229 = vector.load %arg7[%c4_346, %c704_347] : memref<9x1024xbf16, #tpu.memory_space<vmem>>, vector<1x64xbf16>
    tpu.vector_store %arg7[%c4_346, %c704_347], %228 {strides = array<i32>} : memref<9x1024xbf16, #tpu.memory_space<vmem>>, vector<1x64xbf16>,
    %c0_348 = arith.constant 0 : index
    %c13_349 = arith.constant 13 : index
    %c1_350 = arith.constant 1 : index
    %230 = vector.load %arg6[%c0_348, %c13_349, %c1_350] : memref<1x18x66xbf16, #tpu.memory_space<vmem>>, vector<1x1x64xbf16>
    %231 = vector.shape_cast %230 : vector<1x1x64xbf16> to vector<1x64xbf16>
    %c4_351 = arith.constant 4 : index
    %c768_352 = arith.constant 768 : index
    %232 = vector.load %arg7[%c4_351, %c768_352] : memref<9x1024xbf16, #tpu.memory_space<vmem>>, vector<1x64xbf16>
    tpu.vector_store %arg7[%c4_351, %c768_352], %231 {strides = array<i32>} : memref<9x1024xbf16, #tpu.memory_space<vmem>>, vector<1x64xbf16>,
    %c0_353 = arith.constant 0 : index
    %c14_354 = arith.constant 14 : index
    %c1_355 = arith.constant 1 : index
    %233 = vector.load %arg6[%c0_353, %c14_354, %c1_355] : memref<1x18x66xbf16, #tpu.memory_space<vmem>>, vector<1x1x64xbf16>
    %234 = vector.shape_cast %233 : vector<1x1x64xbf16> to vector<1x64xbf16>
    %c4_356 = arith.constant 4 : index
    %c832_357 = arith.constant 832 : index
    %235 = vector.load %arg7[%c4_356, %c832_357] : memref<9x1024xbf16, #tpu.memory_space<vmem>>, vector<1x64xbf16>
    tpu.vector_store %arg7[%c4_356, %c832_357], %234 {strides = array<i32>} : memref<9x1024xbf16, #tpu.memory_space<vmem>>, vector<1x64xbf16>,
    %c0_358 = arith.constant 0 : index
    %c15_359 = arith.constant 15 : index
    %c1_360 = arith.constant 1 : index
    %236 = vector.load %arg6[%c0_358, %c15_359, %c1_360] : memref<1x18x66xbf16, #tpu.memory_space<vmem>>, vector<1x1x64xbf16>
    %237 = vector.shape_cast %236 : vector<1x1x64xbf16> to vector<1x64xbf16>
    %c4_361 = arith.constant 4 : index
    %c896_362 = arith.constant 896 : index
    %238 = vector.load %arg7[%c4_361, %c896_362] : memref<9x1024xbf16, #tpu.memory_space<vmem>>, vector<1x64xbf16>
    tpu.vector_store %arg7[%c4_361, %c896_362], %237 {strides = array<i32>} : memref<9x1024xbf16, #tpu.memory_space<vmem>>, vector<1x64xbf16>,
    %c0_363 = arith.constant 0 : index
    %c16_364 = arith.constant 16 : index
    %c1_365 = arith.constant 1 : index
    %239 = vector.load %arg6[%c0_363, %c16_364, %c1_365] : memref<1x18x66xbf16, #tpu.memory_space<vmem>>, vector<1x1x64xbf16>
    %240 = vector.shape_cast %239 : vector<1x1x64xbf16> to vector<1x64xbf16>
    %c4_366 = arith.constant 4 : index
    %c960_367 = arith.constant 960 : index
    %241 = vector.load %arg7[%c4_366, %c960_367] : memref<9x1024xbf16, #tpu.memory_space<vmem>>, vector<1x64xbf16>
    tpu.vector_store %arg7[%c4_366, %c960_367], %240 {strides = array<i32>} : memref<9x1024xbf16, #tpu.memory_space<vmem>>, vector<1x64xbf16>,
    %c0_368 = arith.constant 0 : index
    %c1_369 = arith.constant 1 : index
    %c2_370 = arith.constant 2 : index
    %242 = vector.load %arg6[%c0_368, %c1_369, %c2_370] : memref<1x18x66xbf16, #tpu.memory_space<vmem>>, vector<1x1x64xbf16>
    %243 = vector.shape_cast %242 : vector<1x1x64xbf16> to vector<1x64xbf16>
    %c5_371 = arith.constant 5 : index
    %c0_372 = arith.constant 0 : index
    %244 = vector.load %arg7[%c5_371, %c0_372] : memref<9x1024xbf16, #tpu.memory_space<vmem>>, vector<1x64xbf16>
    tpu.vector_store %arg7[%c5_371, %c0_372], %243 {strides = array<i32>} : memref<9x1024xbf16, #tpu.memory_space<vmem>>, vector<1x64xbf16>,
    %c0_373 = arith.constant 0 : index
    %c2_374 = arith.constant 2 : index
    %c2_375 = arith.constant 2 : index
    %245 = vector.load %arg6[%c0_373, %c2_374, %c2_375] : memref<1x18x66xbf16, #tpu.memory_space<vmem>>, vector<1x1x64xbf16>
    %246 = vector.shape_cast %245 : vector<1x1x64xbf16> to vector<1x64xbf16>
    %c5_376 = arith.constant 5 : index
    %c64_377 = arith.constant 64 : index
    %247 = vector.load %arg7[%c5_376, %c64_377] : memref<9x1024xbf16, #tpu.memory_space<vmem>>, vector<1x64xbf16>
    tpu.vector_store %arg7[%c5_376, %c64_377], %246 {strides = array<i32>} : memref<9x1024xbf16, #tpu.memory_space<vmem>>, vector<1x64xbf16>,
    %c0_378 = arith.constant 0 : index
    %c3_379 = arith.constant 3 : index
    %c2_380 = arith.constant 2 : index
    %248 = vector.load %arg6[%c0_378, %c3_379, %c2_380] : memref<1x18x66xbf16, #tpu.memory_space<vmem>>, vector<1x1x64xbf16>
    %249 = vector.shape_cast %248 : vector<1x1x64xbf16> to vector<1x64xbf16>
    %c5_381 = arith.constant 5 : index
    %c128_382 = arith.constant 128 : index
    %250 = vector.load %arg7[%c5_381, %c128_382] : memref<9x1024xbf16, #tpu.memory_space<vmem>>, vector<1x64xbf16>
    tpu.vector_store %arg7[%c5_381, %c128_382], %249 {strides = array<i32>} : memref<9x1024xbf16, #tpu.memory_space<vmem>>, vector<1x64xbf16>,
    %c0_383 = arith.constant 0 : index
    %c4_384 = arith.constant 4 : index
    %c2_385 = arith.constant 2 : index
    %251 = vector.load %arg6[%c0_383, %c4_384, %c2_385] : memref<1x18x66xbf16, #tpu.memory_space<vmem>>, vector<1x1x64xbf16>
    %252 = vector.shape_cast %251 : vector<1x1x64xbf16> to vector<1x64xbf16>
    %c5_386 = arith.constant 5 : index
    %c192_387 = arith.constant 192 : index
    %253 = vector.load %arg7[%c5_386, %c192_387] : memref<9x1024xbf16, #tpu.memory_space<vmem>>, vector<1x64xbf16>
    tpu.vector_store %arg7[%c5_386, %c192_387], %252 {strides = array<i32>} : memref<9x1024xbf16, #tpu.memory_space<vmem>>, vector<1x64xbf16>,
    %c0_388 = arith.constant 0 : index
    %c5_389 = arith.constant 5 : index
    %c2_390 = arith.constant 2 : index
    %254 = vector.load %arg6[%c0_388, %c5_389, %c2_390] : memref<1x18x66xbf16, #tpu.memory_space<vmem>>, vector<1x1x64xbf16>
    %255 = vector.shape_cast %254 : vector<1x1x64xbf16> to vector<1x64xbf16>
    %c5_391 = arith.constant 5 : index
    %c256_392 = arith.constant 256 : index
    %256 = vector.load %arg7[%c5_391, %c256_392] : memref<9x1024xbf16, #tpu.memory_space<vmem>>, vector<1x64xbf16>
    tpu.vector_store %arg7[%c5_391, %c256_392], %255 {strides = array<i32>} : memref<9x1024xbf16, #tpu.memory_space<vmem>>, vector<1x64xbf16>,
    %c0_393 = arith.constant 0 : index
    %c6_394 = arith.constant 6 : index
    %c2_395 = arith.constant 2 : index
    %257 = vector.load %arg6[%c0_393, %c6_394, %c2_395] : memref<1x18x66xbf16, #tpu.memory_space<vmem>>, vector<1x1x64xbf16>
    %258 = vector.shape_cast %257 : vector<1x1x64xbf16> to vector<1x64xbf16>
    %c5_396 = arith.constant 5 : index
    %c320_397 = arith.constant 320 : index
    %259 = vector.load %arg7[%c5_396, %c320_397] : memref<9x1024xbf16, #tpu.memory_space<vmem>>, vector<1x64xbf16>
    tpu.vector_store %arg7[%c5_396, %c320_397], %258 {strides = array<i32>} : memref<9x1024xbf16, #tpu.memory_space<vmem>>, vector<1x64xbf16>,
    %c0_398 = arith.constant 0 : index
    %c7_399 = arith.constant 7 : index
    %c2_400 = arith.constant 2 : index
    %260 = vector.load %arg6[%c0_398, %c7_399, %c2_400] : memref<1x18x66xbf16, #tpu.memory_space<vmem>>, vector<1x1x64xbf16>
    %261 = vector.shape_cast %260 : vector<1x1x64xbf16> to vector<1x64xbf16>
    %c5_401 = arith.constant 5 : index
    %c384_402 = arith.constant 384 : index
    %262 = vector.load %arg7[%c5_401, %c384_402] : memref<9x1024xbf16, #tpu.memory_space<vmem>>, vector<1x64xbf16>
    tpu.vector_store %arg7[%c5_401, %c384_402], %261 {strides = array<i32>} : memref<9x1024xbf16, #tpu.memory_space<vmem>>, vector<1x64xbf16>,
    %c0_403 = arith.constant 0 : index
    %c8_404 = arith.constant 8 : index
    %c2_405 = arith.constant 2 : index
    %263 = vector.load %arg6[%c0_403, %c8_404, %c2_405] : memref<1x18x66xbf16, #tpu.memory_space<vmem>>, vector<1x1x64xbf16>
    %264 = vector.shape_cast %263 : vector<1x1x64xbf16> to vector<1x64xbf16>
    %c5_406 = arith.constant 5 : index
    %c448_407 = arith.constant 448 : index
    %265 = vector.load %arg7[%c5_406, %c448_407] : memref<9x1024xbf16, #tpu.memory_space<vmem>>, vector<1x64xbf16>
    tpu.vector_store %arg7[%c5_406, %c448_407], %264 {strides = array<i32>} : memref<9x1024xbf16, #tpu.memory_space<vmem>>, vector<1x64xbf16>,
    %c0_408 = arith.constant 0 : index
    %c9_409 = arith.constant 9 : index
    %c2_410 = arith.constant 2 : index
    %266 = vector.load %arg6[%c0_408, %c9_409, %c2_410] : memref<1x18x66xbf16, #tpu.memory_space<vmem>>, vector<1x1x64xbf16>
    %267 = vector.shape_cast %266 : vector<1x1x64xbf16> to vector<1x64xbf16>
    %c5_411 = arith.constant 5 : index
    %c512_412 = arith.constant 512 : index
    %268 = vector.load %arg7[%c5_411, %c512_412] : memref<9x1024xbf16, #tpu.memory_space<vmem>>, vector<1x64xbf16>
    tpu.vector_store %arg7[%c5_411, %c512_412], %267 {strides = array<i32>} : memref<9x1024xbf16, #tpu.memory_space<vmem>>, vector<1x64xbf16>,
    %c0_413 = arith.constant 0 : index
    %c10_414 = arith.constant 10 : index
    %c2_415 = arith.constant 2 : index
    %269 = vector.load %arg6[%c0_413, %c10_414, %c2_415] : memref<1x18x66xbf16, #tpu.memory_space<vmem>>, vector<1x1x64xbf16>
    %270 = vector.shape_cast %269 : vector<1x1x64xbf16> to vector<1x64xbf16>
    %c5_416 = arith.constant 5 : index
    %c576_417 = arith.constant 576 : index
    %271 = vector.load %arg7[%c5_416, %c576_417] : memref<9x1024xbf16, #tpu.memory_space<vmem>>, vector<1x64xbf16>
    tpu.vector_store %arg7[%c5_416, %c576_417], %270 {strides = array<i32>} : memref<9x1024xbf16, #tpu.memory_space<vmem>>, vector<1x64xbf16>,
    %c0_418 = arith.constant 0 : index
    %c11_419 = arith.constant 11 : index
    %c2_420 = arith.constant 2 : index
    %272 = vector.load %arg6[%c0_418, %c11_419, %c2_420] : memref<1x18x66xbf16, #tpu.memory_space<vmem>>, vector<1x1x64xbf16>
    %273 = vector.shape_cast %272 : vector<1x1x64xbf16> to vector<1x64xbf16>
    %c5_421 = arith.constant 5 : index
    %c640_422 = arith.constant 640 : index
    %274 = vector.load %arg7[%c5_421, %c640_422] : memref<9x1024xbf16, #tpu.memory_space<vmem>>, vector<1x64xbf16>
    tpu.vector_store %arg7[%c5_421, %c640_422], %273 {strides = array<i32>} : memref<9x1024xbf16, #tpu.memory_space<vmem>>, vector<1x64xbf16>,
    %c0_423 = arith.constant 0 : index
    %c12_424 = arith.constant 12 : index
    %c2_425 = arith.constant 2 : index
    %275 = vector.load %arg6[%c0_423, %c12_424, %c2_425] : memref<1x18x66xbf16, #tpu.memory_space<vmem>>, vector<1x1x64xbf16>
    %276 = vector.shape_cast %275 : vector<1x1x64xbf16> to vector<1x64xbf16>
    %c5_426 = arith.constant 5 : index
    %c704_427 = arith.constant 704 : index
    %277 = vector.load %arg7[%c5_426, %c704_427] : memref<9x1024xbf16, #tpu.memory_space<vmem>>, vector<1x64xbf16>
    tpu.vector_store %arg7[%c5_426, %c704_427], %276 {strides = array<i32>} : memref<9x1024xbf16, #tpu.memory_space<vmem>>, vector<1x64xbf16>,
    %c0_428 = arith.constant 0 : index
    %c13_429 = arith.constant 13 : index
    %c2_430 = arith.constant 2 : index
    %278 = vector.load %arg6[%c0_428, %c13_429, %c2_430] : memref<1x18x66xbf16, #tpu.memory_space<vmem>>, vector<1x1x64xbf16>
    %279 = vector.shape_cast %278 : vector<1x1x64xbf16> to vector<1x64xbf16>
    %c5_431 = arith.constant 5 : index
    %c768_432 = arith.constant 768 : index
    %280 = vector.load %arg7[%c5_431, %c768_432] : memref<9x1024xbf16, #tpu.memory_space<vmem>>, vector<1x64xbf16>
    tpu.vector_store %arg7[%c5_431, %c768_432], %279 {strides = array<i32>} : memref<9x1024xbf16, #tpu.memory_space<vmem>>, vector<1x64xbf16>,
    %c0_433 = arith.constant 0 : index
    %c14_434 = arith.constant 14 : index
    %c2_435 = arith.constant 2 : index
    %281 = vector.load %arg6[%c0_433, %c14_434, %c2_435] : memref<1x18x66xbf16, #tpu.memory_space<vmem>>, vector<1x1x64xbf16>
    %282 = vector.shape_cast %281 : vector<1x1x64xbf16> to vector<1x64xbf16>
    %c5_436 = arith.constant 5 : index
    %c832_437 = arith.constant 832 : index
    %283 = vector.load %arg7[%c5_436, %c832_437] : memref<9x1024xbf16, #tpu.memory_space<vmem>>, vector<1x64xbf16>
    tpu.vector_store %arg7[%c5_436, %c832_437], %282 {strides = array<i32>} : memref<9x1024xbf16, #tpu.memory_space<vmem>>, vector<1x64xbf16>,
    %c0_438 = arith.constant 0 : index
    %c15_439 = arith.constant 15 : index
    %c2_440 = arith.constant 2 : index
    %284 = vector.load %arg6[%c0_438, %c15_439, %c2_440] : memref<1x18x66xbf16, #tpu.memory_space<vmem>>, vector<1x1x64xbf16>
    %285 = vector.shape_cast %284 : vector<1x1x64xbf16> to vector<1x64xbf16>
    %c5_441 = arith.constant 5 : index
    %c896_442 = arith.constant 896 : index
    %286 = vector.load %arg7[%c5_441, %c896_442] : memref<9x1024xbf16, #tpu.memory_space<vmem>>, vector<1x64xbf16>
    tpu.vector_store %arg7[%c5_441, %c896_442], %285 {strides = array<i32>} : memref<9x1024xbf16, #tpu.memory_space<vmem>>, vector<1x64xbf16>,
    %c0_443 = arith.constant 0 : index
    %c16_444 = arith.constant 16 : index
    %c2_445 = arith.constant 2 : index
    %287 = vector.load %arg6[%c0_443, %c16_444, %c2_445] : memref<1x18x66xbf16, #tpu.memory_space<vmem>>, vector<1x1x64xbf16>
    %288 = vector.shape_cast %287 : vector<1x1x64xbf16> to vector<1x64xbf16>
    %c5_446 = arith.constant 5 : index
    %c960_447 = arith.constant 960 : index
    %289 = vector.load %arg7[%c5_446, %c960_447] : memref<9x1024xbf16, #tpu.memory_space<vmem>>, vector<1x64xbf16>
    tpu.vector_store %arg7[%c5_446, %c960_447], %288 {strides = array<i32>} : memref<9x1024xbf16, #tpu.memory_space<vmem>>, vector<1x64xbf16>,
    %c0_448 = arith.constant 0 : index
    %c2_449 = arith.constant 2 : index
    %c0_450 = arith.constant 0 : index
    %290 = vector.load %arg6[%c0_448, %c2_449, %c0_450] : memref<1x18x66xbf16, #tpu.memory_space<vmem>>, vector<1x1x64xbf16>
    %291 = vector.shape_cast %290 : vector<1x1x64xbf16> to vector<1x64xbf16>
    %c6_451 = arith.constant 6 : index
    %c0_452 = arith.constant 0 : index
    %292 = vector.load %arg7[%c6_451, %c0_452] : memref<9x1024xbf16, #tpu.memory_space<vmem>>, vector<1x64xbf16>
    tpu.vector_store %arg7[%c6_451, %c0_452], %291 {strides = array<i32>} : memref<9x1024xbf16, #tpu.memory_space<vmem>>, vector<1x64xbf16>,
    %c0_453 = arith.constant 0 : index
    %c3_454 = arith.constant 3 : index
    %c0_455 = arith.constant 0 : index
    %293 = vector.load %arg6[%c0_453, %c3_454, %c0_455] : memref<1x18x66xbf16, #tpu.memory_space<vmem>>, vector<1x1x64xbf16>
    %294 = vector.shape_cast %293 : vector<1x1x64xbf16> to vector<1x64xbf16>
    %c6_456 = arith.constant 6 : index
    %c64_457 = arith.constant 64 : index
    %295 = vector.load %arg7[%c6_456, %c64_457] : memref<9x1024xbf16, #tpu.memory_space<vmem>>, vector<1x64xbf16>
    tpu.vector_store %arg7[%c6_456, %c64_457], %294 {strides = array<i32>} : memref<9x1024xbf16, #tpu.memory_space<vmem>>, vector<1x64xbf16>,
    %c0_458 = arith.constant 0 : index
    %c4_459 = arith.constant 4 : index
    %c0_460 = arith.constant 0 : index
    %296 = vector.load %arg6[%c0_458, %c4_459, %c0_460] : memref<1x18x66xbf16, #tpu.memory_space<vmem>>, vector<1x1x64xbf16>
    %297 = vector.shape_cast %296 : vector<1x1x64xbf16> to vector<1x64xbf16>
    %c6_461 = arith.constant 6 : index
    %c128_462 = arith.constant 128 : index
    %298 = vector.load %arg7[%c6_461, %c128_462] : memref<9x1024xbf16, #tpu.memory_space<vmem>>, vector<1x64xbf16>
    tpu.vector_store %arg7[%c6_461, %c128_462], %297 {strides = array<i32>} : memref<9x1024xbf16, #tpu.memory_space<vmem>>, vector<1x64xbf16>,
    %c0_463 = arith.constant 0 : index
    %c5_464 = arith.constant 5 : index
    %c0_465 = arith.constant 0 : index
    %299 = vector.load %arg6[%c0_463, %c5_464, %c0_465] : memref<1x18x66xbf16, #tpu.memory_space<vmem>>, vector<1x1x64xbf16>
    %300 = vector.shape_cast %299 : vector<1x1x64xbf16> to vector<1x64xbf16>
    %c6_466 = arith.constant 6 : index
    %c192_467 = arith.constant 192 : index
    %301 = vector.load %arg7[%c6_466, %c192_467] : memref<9x1024xbf16, #tpu.memory_space<vmem>>, vector<1x64xbf16>
    tpu.vector_store %arg7[%c6_466, %c192_467], %300 {strides = array<i32>} : memref<9x1024xbf16, #tpu.memory_space<vmem>>, vector<1x64xbf16>,
    %c0_468 = arith.constant 0 : index
    %c6_469 = arith.constant 6 : index
    %c0_470 = arith.constant 0 : index
    %302 = vector.load %arg6[%c0_468, %c6_469, %c0_470] : memref<1x18x66xbf16, #tpu.memory_space<vmem>>, vector<1x1x64xbf16>
    %303 = vector.shape_cast %302 : vector<1x1x64xbf16> to vector<1x64xbf16>
    %c6_471 = arith.constant 6 : index
    %c256_472 = arith.constant 256 : index
    %304 = vector.load %arg7[%c6_471, %c256_472] : memref<9x1024xbf16, #tpu.memory_space<vmem>>, vector<1x64xbf16>
    tpu.vector_store %arg7[%c6_471, %c256_472], %303 {strides = array<i32>} : memref<9x1024xbf16, #tpu.memory_space<vmem>>, vector<1x64xbf16>,
    %c0_473 = arith.constant 0 : index
    %c7_474 = arith.constant 7 : index
    %c0_475 = arith.constant 0 : index
    %305 = vector.load %arg6[%c0_473, %c7_474, %c0_475] : memref<1x18x66xbf16, #tpu.memory_space<vmem>>, vector<1x1x64xbf16>
    %306 = vector.shape_cast %305 : vector<1x1x64xbf16> to vector<1x64xbf16>
    %c6_476 = arith.constant 6 : index
    %c320_477 = arith.constant 320 : index
    %307 = vector.load %arg7[%c6_476, %c320_477] : memref<9x1024xbf16, #tpu.memory_space<vmem>>, vector<1x64xbf16>
    tpu.vector_store %arg7[%c6_476, %c320_477], %306 {strides = array<i32>} : memref<9x1024xbf16, #tpu.memory_space<vmem>>, vector<1x64xbf16>,
    %c0_478 = arith.constant 0 : index
    %c8_479 = arith.constant 8 : index
    %c0_480 = arith.constant 0 : index
    %308 = vector.load %arg6[%c0_478, %c8_479, %c0_480] : memref<1x18x66xbf16, #tpu.memory_space<vmem>>, vector<1x1x64xbf16>
    %309 = vector.shape_cast %308 : vector<1x1x64xbf16> to vector<1x64xbf16>
    %c6_481 = arith.constant 6 : index
    %c384_482 = arith.constant 384 : index
    %310 = vector.load %arg7[%c6_481, %c384_482] : memref<9x1024xbf16, #tpu.memory_space<vmem>>, vector<1x64xbf16>
    tpu.vector_store %arg7[%c6_481, %c384_482], %309 {strides = array<i32>} : memref<9x1024xbf16, #tpu.memory_space<vmem>>, vector<1x64xbf16>,
    %c0_483 = arith.constant 0 : index
    %c9_484 = arith.constant 9 : index
    %c0_485 = arith.constant 0 : index
    %311 = vector.load %arg6[%c0_483, %c9_484, %c0_485] : memref<1x18x66xbf16, #tpu.memory_space<vmem>>, vector<1x1x64xbf16>
    %312 = vector.shape_cast %311 : vector<1x1x64xbf16> to vector<1x64xbf16>
    %c6_486 = arith.constant 6 : index
    %c448_487 = arith.constant 448 : index
    %313 = vector.load %arg7[%c6_486, %c448_487] : memref<9x1024xbf16, #tpu.memory_space<vmem>>, vector<1x64xbf16>
    tpu.vector_store %arg7[%c6_486, %c448_487], %312 {strides = array<i32>} : memref<9x1024xbf16, #tpu.memory_space<vmem>>, vector<1x64xbf16>,
    %c0_488 = arith.constant 0 : index
    %c10_489 = arith.constant 10 : index
    %c0_490 = arith.constant 0 : index
    %314 = vector.load %arg6[%c0_488, %c10_489, %c0_490] : memref<1x18x66xbf16, #tpu.memory_space<vmem>>, vector<1x1x64xbf16>
    %315 = vector.shape_cast %314 : vector<1x1x64xbf16> to vector<1x64xbf16>
    %c6_491 = arith.constant 6 : index
    %c512_492 = arith.constant 512 : index
    %316 = vector.load %arg7[%c6_491, %c512_492] : memref<9x1024xbf16, #tpu.memory_space<vmem>>, vector<1x64xbf16>
    tpu.vector_store %arg7[%c6_491, %c512_492], %315 {strides = array<i32>} : memref<9x1024xbf16, #tpu.memory_space<vmem>>, vector<1x64xbf16>,
    %c0_493 = arith.constant 0 : index
    %c11_494 = arith.constant 11 : index
    %c0_495 = arith.constant 0 : index
    %317 = vector.load %arg6[%c0_493, %c11_494, %c0_495] : memref<1x18x66xbf16, #tpu.memory_space<vmem>>, vector<1x1x64xbf16>
    %318 = vector.shape_cast %317 : vector<1x1x64xbf16> to vector<1x64xbf16>
    %c6_496 = arith.constant 6 : index
    %c576_497 = arith.constant 576 : index
    %319 = vector.load %arg7[%c6_496, %c576_497] : memref<9x1024xbf16, #tpu.memory_space<vmem>>, vector<1x64xbf16>
    tpu.vector_store %arg7[%c6_496, %c576_497], %318 {strides = array<i32>} : memref<9x1024xbf16, #tpu.memory_space<vmem>>, vector<1x64xbf16>,
    %c0_498 = arith.constant 0 : index
    %c12_499 = arith.constant 12 : index
    %c0_500 = arith.constant 0 : index
    %320 = vector.load %arg6[%c0_498, %c12_499, %c0_500] : memref<1x18x66xbf16, #tpu.memory_space<vmem>>, vector<1x1x64xbf16>
    %321 = vector.shape_cast %320 : vector<1x1x64xbf16> to vector<1x64xbf16>
    %c6_501 = arith.constant 6 : index
    %c640_502 = arith.constant 640 : index
    %322 = vector.load %arg7[%c6_501, %c640_502] : memref<9x1024xbf16, #tpu.memory_space<vmem>>, vector<1x64xbf16>
    tpu.vector_store %arg7[%c6_501, %c640_502], %321 {strides = array<i32>} : memref<9x1024xbf16, #tpu.memory_space<vmem>>, vector<1x64xbf16>,
    %c0_503 = arith.constant 0 : index
    %c13_504 = arith.constant 13 : index
    %c0_505 = arith.constant 0 : index
    %323 = vector.load %arg6[%c0_503, %c13_504, %c0_505] : memref<1x18x66xbf16, #tpu.memory_space<vmem>>, vector<1x1x64xbf16>
    %324 = vector.shape_cast %323 : vector<1x1x64xbf16> to vector<1x64xbf16>
    %c6_506 = arith.constant 6 : index
    %c704_507 = arith.constant 704 : index
    %325 = vector.load %arg7[%c6_506, %c704_507] : memref<9x1024xbf16, #tpu.memory_space<vmem>>, vector<1x64xbf16>
    tpu.vector_store %arg7[%c6_506, %c704_507], %324 {strides = array<i32>} : memref<9x1024xbf16, #tpu.memory_space<vmem>>, vector<1x64xbf16>,
    %c0_508 = arith.constant 0 : index
    %c14_509 = arith.constant 14 : index
    %c0_510 = arith.constant 0 : index
    %326 = vector.load %arg6[%c0_508, %c14_509, %c0_510] : memref<1x18x66xbf16, #tpu.memory_space<vmem>>, vector<1x1x64xbf16>
    %327 = vector.shape_cast %326 : vector<1x1x64xbf16> to vector<1x64xbf16>
    %c6_511 = arith.constant 6 : index
    %c768_512 = arith.constant 768 : index
    %328 = vector.load %arg7[%c6_511, %c768_512] : memref<9x1024xbf16, #tpu.memory_space<vmem>>, vector<1x64xbf16>
    tpu.vector_store %arg7[%c6_511, %c768_512], %327 {strides = array<i32>} : memref<9x1024xbf16, #tpu.memory_space<vmem>>, vector<1x64xbf16>,
    %c0_513 = arith.constant 0 : index
    %c15_514 = arith.constant 15 : index
    %c0_515 = arith.constant 0 : index
    %329 = vector.load %arg6[%c0_513, %c15_514, %c0_515] : memref<1x18x66xbf16, #tpu.memory_space<vmem>>, vector<1x1x64xbf16>
    %330 = vector.shape_cast %329 : vector<1x1x64xbf16> to vector<1x64xbf16>
    %c6_516 = arith.constant 6 : index
    %c832_517 = arith.constant 832 : index
    %331 = vector.load %arg7[%c6_516, %c832_517] : memref<9x1024xbf16, #tpu.memory_space<vmem>>, vector<1x64xbf16>
    tpu.vector_store %arg7[%c6_516, %c832_517], %330 {strides = array<i32>} : memref<9x1024xbf16, #tpu.memory_space<vmem>>, vector<1x64xbf16>,
    %c0_518 = arith.constant 0 : index
    %c16_519 = arith.constant 16 : index
    %c0_520 = arith.constant 0 : index
    %332 = vector.load %arg6[%c0_518, %c16_519, %c0_520] : memref<1x18x66xbf16, #tpu.memory_space<vmem>>, vector<1x1x64xbf16>
    %333 = vector.shape_cast %332 : vector<1x1x64xbf16> to vector<1x64xbf16>
    %c6_521 = arith.constant 6 : index
    %c896_522 = arith.constant 896 : index
    %334 = vector.load %arg7[%c6_521, %c896_522] : memref<9x1024xbf16, #tpu.memory_space<vmem>>, vector<1x64xbf16>
    tpu.vector_store %arg7[%c6_521, %c896_522], %333 {strides = array<i32>} : memref<9x1024xbf16, #tpu.memory_space<vmem>>, vector<1x64xbf16>,
    %c0_523 = arith.constant 0 : index
    %c17 = arith.constant 17 : index
    %c0_524 = arith.constant 0 : index
    %335 = vector.load %arg6[%c0_523, %c17, %c0_524] : memref<1x18x66xbf16, #tpu.memory_space<vmem>>, vector<1x1x64xbf16>
    %336 = vector.shape_cast %335 : vector<1x1x64xbf16> to vector<1x64xbf16>
    %c6_525 = arith.constant 6 : index
    %c960_526 = arith.constant 960 : index
    %337 = vector.load %arg7[%c6_525, %c960_526] : memref<9x1024xbf16, #tpu.memory_space<vmem>>, vector<1x64xbf16>
    tpu.vector_store %arg7[%c6_525, %c960_526], %336 {strides = array<i32>} : memref<9x1024xbf16, #tpu.memory_space<vmem>>, vector<1x64xbf16>,
    %c0_527 = arith.constant 0 : index
    %c2_528 = arith.constant 2 : index
    %c1_529 = arith.constant 1 : index
    %338 = vector.load %arg6[%c0_527, %c2_528, %c1_529] : memref<1x18x66xbf16, #tpu.memory_space<vmem>>, vector<1x1x64xbf16>
    %339 = vector.shape_cast %338 : vector<1x1x64xbf16> to vector<1x64xbf16>
    %c7_530 = arith.constant 7 : index
    %c0_531 = arith.constant 0 : index
    %340 = vector.load %arg7[%c7_530, %c0_531] : memref<9x1024xbf16, #tpu.memory_space<vmem>>, vector<1x64xbf16>
    tpu.vector_store %arg7[%c7_530, %c0_531], %339 {strides = array<i32>} : memref<9x1024xbf16, #tpu.memory_space<vmem>>, vector<1x64xbf16>,
    %c0_532 = arith.constant 0 : index
    %c3_533 = arith.constant 3 : index
    %c1_534 = arith.constant 1 : index
    %341 = vector.load %arg6[%c0_532, %c3_533, %c1_534] : memref<1x18x66xbf16, #tpu.memory_space<vmem>>, vector<1x1x64xbf16>
    %342 = vector.shape_cast %341 : vector<1x1x64xbf16> to vector<1x64xbf16>
    %c7_535 = arith.constant 7 : index
    %c64_536 = arith.constant 64 : index
    %343 = vector.load %arg7[%c7_535, %c64_536] : memref<9x1024xbf16, #tpu.memory_space<vmem>>, vector<1x64xbf16>
    tpu.vector_store %arg7[%c7_535, %c64_536], %342 {strides = array<i32>} : memref<9x1024xbf16, #tpu.memory_space<vmem>>, vector<1x64xbf16>,
    %c0_537 = arith.constant 0 : index
    %c4_538 = arith.constant 4 : index
    %c1_539 = arith.constant 1 : index
    %344 = vector.load %arg6[%c0_537, %c4_538, %c1_539] : memref<1x18x66xbf16, #tpu.memory_space<vmem>>, vector<1x1x64xbf16>
    %345 = vector.shape_cast %344 : vector<1x1x64xbf16> to vector<1x64xbf16>
    %c7_540 = arith.constant 7 : index
    %c128_541 = arith.constant 128 : index
    %346 = vector.load %arg7[%c7_540, %c128_541] : memref<9x1024xbf16, #tpu.memory_space<vmem>>, vector<1x64xbf16>
    tpu.vector_store %arg7[%c7_540, %c128_541], %345 {strides = array<i32>} : memref<9x1024xbf16, #tpu.memory_space<vmem>>, vector<1x64xbf16>,
    %c0_542 = arith.constant 0 : index
    %c5_543 = arith.constant 5 : index
    %c1_544 = arith.constant 1 : index
    %347 = vector.load %arg6[%c0_542, %c5_543, %c1_544] : memref<1x18x66xbf16, #tpu.memory_space<vmem>>, vector<1x1x64xbf16>
    %348 = vector.shape_cast %347 : vector<1x1x64xbf16> to vector<1x64xbf16>
    %c7_545 = arith.constant 7 : index
    %c192_546 = arith.constant 192 : index
    %349 = vector.load %arg7[%c7_545, %c192_546] : memref<9x1024xbf16, #tpu.memory_space<vmem>>, vector<1x64xbf16>
    tpu.vector_store %arg7[%c7_545, %c192_546], %348 {strides = array<i32>} : memref<9x1024xbf16, #tpu.memory_space<vmem>>, vector<1x64xbf16>,
    %c0_547 = arith.constant 0 : index
    %c6_548 = arith.constant 6 : index
    %c1_549 = arith.constant 1 : index
    %350 = vector.load %arg6[%c0_547, %c6_548, %c1_549] : memref<1x18x66xbf16, #tpu.memory_space<vmem>>, vector<1x1x64xbf16>
    %351 = vector.shape_cast %350 : vector<1x1x64xbf16> to vector<1x64xbf16>
    %c7_550 = arith.constant 7 : index
    %c256_551 = arith.constant 256 : index
    %352 = vector.load %arg7[%c7_550, %c256_551] : memref<9x1024xbf16, #tpu.memory_space<vmem>>, vector<1x64xbf16>
    tpu.vector_store %arg7[%c7_550, %c256_551], %351 {strides = array<i32>} : memref<9x1024xbf16, #tpu.memory_space<vmem>>, vector<1x64xbf16>,
    %c0_552 = arith.constant 0 : index
    %c7_553 = arith.constant 7 : index
    %c1_554 = arith.constant 1 : index
    %353 = vector.load %arg6[%c0_552, %c7_553, %c1_554] : memref<1x18x66xbf16, #tpu.memory_space<vmem>>, vector<1x1x64xbf16>
    %354 = vector.shape_cast %353 : vector<1x1x64xbf16> to vector<1x64xbf16>
    %c7_555 = arith.constant 7 : index
    %c320_556 = arith.constant 320 : index
    %355 = vector.load %arg7[%c7_555, %c320_556] : memref<9x1024xbf16, #tpu.memory_space<vmem>>, vector<1x64xbf16>
    tpu.vector_store %arg7[%c7_555, %c320_556], %354 {strides = array<i32>} : memref<9x1024xbf16, #tpu.memory_space<vmem>>, vector<1x64xbf16>,
    %c0_557 = arith.constant 0 : index
    %c8_558 = arith.constant 8 : index
    %c1_559 = arith.constant 1 : index
    %356 = vector.load %arg6[%c0_557, %c8_558, %c1_559] : memref<1x18x66xbf16, #tpu.memory_space<vmem>>, vector<1x1x64xbf16>
    %357 = vector.shape_cast %356 : vector<1x1x64xbf16> to vector<1x64xbf16>
    %c7_560 = arith.constant 7 : index
    %c384_561 = arith.constant 384 : index
    %358 = vector.load %arg7[%c7_560, %c384_561] : memref<9x1024xbf16, #tpu.memory_space<vmem>>, vector<1x64xbf16>
    tpu.vector_store %arg7[%c7_560, %c384_561], %357 {strides = array<i32>} : memref<9x1024xbf16, #tpu.memory_space<vmem>>, vector<1x64xbf16>,
    %c0_562 = arith.constant 0 : index
    %c9_563 = arith.constant 9 : index
    %c1_564 = arith.constant 1 : index
    %359 = vector.load %arg6[%c0_562, %c9_563, %c1_564] : memref<1x18x66xbf16, #tpu.memory_space<vmem>>, vector<1x1x64xbf16>
    %360 = vector.shape_cast %359 : vector<1x1x64xbf16> to vector<1x64xbf16>
    %c7_565 = arith.constant 7 : index
    %c448_566 = arith.constant 448 : index
    %361 = vector.load %arg7[%c7_565, %c448_566] : memref<9x1024xbf16, #tpu.memory_space<vmem>>, vector<1x64xbf16>
    tpu.vector_store %arg7[%c7_565, %c448_566], %360 {strides = array<i32>} : memref<9x1024xbf16, #tpu.memory_space<vmem>>, vector<1x64xbf16>,
    %c0_567 = arith.constant 0 : index
    %c10_568 = arith.constant 10 : index
    %c1_569 = arith.constant 1 : index
    %362 = vector.load %arg6[%c0_567, %c10_568, %c1_569] : memref<1x18x66xbf16, #tpu.memory_space<vmem>>, vector<1x1x64xbf16>
    %363 = vector.shape_cast %362 : vector<1x1x64xbf16> to vector<1x64xbf16>
    %c7_570 = arith.constant 7 : index
    %c512_571 = arith.constant 512 : index
    %364 = vector.load %arg7[%c7_570, %c512_571] : memref<9x1024xbf16, #tpu.memory_space<vmem>>, vector<1x64xbf16>
    tpu.vector_store %arg7[%c7_570, %c512_571], %363 {strides = array<i32>} : memref<9x1024xbf16, #tpu.memory_space<vmem>>, vector<1x64xbf16>,
    %c0_572 = arith.constant 0 : index
    %c11_573 = arith.constant 11 : index
    %c1_574 = arith.constant 1 : index
    %365 = vector.load %arg6[%c0_572, %c11_573, %c1_574] : memref<1x18x66xbf16, #tpu.memory_space<vmem>>, vector<1x1x64xbf16>
    %366 = vector.shape_cast %365 : vector<1x1x64xbf16> to vector<1x64xbf16>
    %c7_575 = arith.constant 7 : index
    %c576_576 = arith.constant 576 : index
    %367 = vector.load %arg7[%c7_575, %c576_576] : memref<9x1024xbf16, #tpu.memory_space<vmem>>, vector<1x64xbf16>
    tpu.vector_store %arg7[%c7_575, %c576_576], %366 {strides = array<i32>} : memref<9x1024xbf16, #tpu.memory_space<vmem>>, vector<1x64xbf16>,
    %c0_577 = arith.constant 0 : index
    %c12_578 = arith.constant 12 : index
    %c1_579 = arith.constant 1 : index
    %368 = vector.load %arg6[%c0_577, %c12_578, %c1_579] : memref<1x18x66xbf16, #tpu.memory_space<vmem>>, vector<1x1x64xbf16>
    %369 = vector.shape_cast %368 : vector<1x1x64xbf16> to vector<1x64xbf16>
    %c7_580 = arith.constant 7 : index
    %c640_581 = arith.constant 640 : index
    %370 = vector.load %arg7[%c7_580, %c640_581] : memref<9x1024xbf16, #tpu.memory_space<vmem>>, vector<1x64xbf16>
    tpu.vector_store %arg7[%c7_580, %c640_581], %369 {strides = array<i32>} : memref<9x1024xbf16, #tpu.memory_space<vmem>>, vector<1x64xbf16>,
    %c0_582 = arith.constant 0 : index
    %c13_583 = arith.constant 13 : index
    %c1_584 = arith.constant 1 : index
    %371 = vector.load %arg6[%c0_582, %c13_583, %c1_584] : memref<1x18x66xbf16, #tpu.memory_space<vmem>>, vector<1x1x64xbf16>
    %372 = vector.shape_cast %371 : vector<1x1x64xbf16> to vector<1x64xbf16>
    %c7_585 = arith.constant 7 : index
    %c704_586 = arith.constant 704 : index
    %373 = vector.load %arg7[%c7_585, %c704_586] : memref<9x1024xbf16, #tpu.memory_space<vmem>>, vector<1x64xbf16>
    tpu.vector_store %arg7[%c7_585, %c704_586], %372 {strides = array<i32>} : memref<9x1024xbf16, #tpu.memory_space<vmem>>, vector<1x64xbf16>,
    %c0_587 = arith.constant 0 : index
    %c14_588 = arith.constant 14 : index
    %c1_589 = arith.constant 1 : index
    %374 = vector.load %arg6[%c0_587, %c14_588, %c1_589] : memref<1x18x66xbf16, #tpu.memory_space<vmem>>, vector<1x1x64xbf16>
    %375 = vector.shape_cast %374 : vector<1x1x64xbf16> to vector<1x64xbf16>
    %c7_590 = arith.constant 7 : index
    %c768_591 = arith.constant 768 : index
    %376 = vector.load %arg7[%c7_590, %c768_591] : memref<9x1024xbf16, #tpu.memory_space<vmem>>, vector<1x64xbf16>
    tpu.vector_store %arg7[%c7_590, %c768_591], %375 {strides = array<i32>} : memref<9x1024xbf16, #tpu.memory_space<vmem>>, vector<1x64xbf16>,
    %c0_592 = arith.constant 0 : index
    %c15_593 = arith.constant 15 : index
    %c1_594 = arith.constant 1 : index
    %377 = vector.load %arg6[%c0_592, %c15_593, %c1_594] : memref<1x18x66xbf16, #tpu.memory_space<vmem>>, vector<1x1x64xbf16>
    %378 = vector.shape_cast %377 : vector<1x1x64xbf16> to vector<1x64xbf16>
    %c7_595 = arith.constant 7 : index
    %c832_596 = arith.constant 832 : index
    %379 = vector.load %arg7[%c7_595, %c832_596] : memref<9x1024xbf16, #tpu.memory_space<vmem>>, vector<1x64xbf16>
    tpu.vector_store %arg7[%c7_595, %c832_596], %378 {strides = array<i32>} : memref<9x1024xbf16, #tpu.memory_space<vmem>>, vector<1x64xbf16>,
    %c0_597 = arith.constant 0 : index
    %c16_598 = arith.constant 16 : index
    %c1_599 = arith.constant 1 : index
    %380 = vector.load %arg6[%c0_597, %c16_598, %c1_599] : memref<1x18x66xbf16, #tpu.memory_space<vmem>>, vector<1x1x64xbf16>
    %381 = vector.shape_cast %380 : vector<1x1x64xbf16> to vector<1x64xbf16>
    %c7_600 = arith.constant 7 : index
    %c896_601 = arith.constant 896 : index
    %382 = vector.load %arg7[%c7_600, %c896_601] : memref<9x1024xbf16, #tpu.memory_space<vmem>>, vector<1x64xbf16>
    tpu.vector_store %arg7[%c7_600, %c896_601], %381 {strides = array<i32>} : memref<9x1024xbf16, #tpu.memory_space<vmem>>, vector<1x64xbf16>,
    %c0_602 = arith.constant 0 : index
    %c17_603 = arith.constant 17 : index
    %c1_604 = arith.constant 1 : index
    %383 = vector.load %arg6[%c0_602, %c17_603, %c1_604] : memref<1x18x66xbf16, #tpu.memory_space<vmem>>, vector<1x1x64xbf16>
    %384 = vector.shape_cast %383 : vector<1x1x64xbf16> to vector<1x64xbf16>
    %c7_605 = arith.constant 7 : index
    %c960_606 = arith.constant 960 : index
    %385 = vector.load %arg7[%c7_605, %c960_606] : memref<9x1024xbf16, #tpu.memory_space<vmem>>, vector<1x64xbf16>
    tpu.vector_store %arg7[%c7_605, %c960_606], %384 {strides = array<i32>} : memref<9x1024xbf16, #tpu.memory_space<vmem>>, vector<1x64xbf16>,
    %c0_607 = arith.constant 0 : index
    %c2_608 = arith.constant 2 : index
    %c2_609 = arith.constant 2 : index
    %386 = vector.load %arg6[%c0_607, %c2_608, %c2_609] : memref<1x18x66xbf16, #tpu.memory_space<vmem>>, vector<1x1x64xbf16>
    %387 = vector.shape_cast %386 : vector<1x1x64xbf16> to vector<1x64xbf16>
    %c8_610 = arith.constant 8 : index
    %c0_611 = arith.constant 0 : index
    %388 = vector.load %arg7[%c8_610, %c0_611] : memref<9x1024xbf16, #tpu.memory_space<vmem>>, vector<1x64xbf16>
    tpu.vector_store %arg7[%c8_610, %c0_611], %387 {strides = array<i32>} : memref<9x1024xbf16, #tpu.memory_space<vmem>>, vector<1x64xbf16>,
    %c0_612 = arith.constant 0 : index
    %c3_613 = arith.constant 3 : index
    %c2_614 = arith.constant 2 : index
    %389 = vector.load %arg6[%c0_612, %c3_613, %c2_614] : memref<1x18x66xbf16, #tpu.memory_space<vmem>>, vector<1x1x64xbf16>
    %390 = vector.shape_cast %389 : vector<1x1x64xbf16> to vector<1x64xbf16>
    %c8_615 = arith.constant 8 : index
    %c64_616 = arith.constant 64 : index
    %391 = vector.load %arg7[%c8_615, %c64_616] : memref<9x1024xbf16, #tpu.memory_space<vmem>>, vector<1x64xbf16>
    tpu.vector_store %arg7[%c8_615, %c64_616], %390 {strides = array<i32>} : memref<9x1024xbf16, #tpu.memory_space<vmem>>, vector<1x64xbf16>,
    %c0_617 = arith.constant 0 : index
    %c4_618 = arith.constant 4 : index
    %c2_619 = arith.constant 2 : index
    %392 = vector.load %arg6[%c0_617, %c4_618, %c2_619] : memref<1x18x66xbf16, #tpu.memory_space<vmem>>, vector<1x1x64xbf16>
    %393 = vector.shape_cast %392 : vector<1x1x64xbf16> to vector<1x64xbf16>
    %c8_620 = arith.constant 8 : index
    %c128_621 = arith.constant 128 : index
    %394 = vector.load %arg7[%c8_620, %c128_621] : memref<9x1024xbf16, #tpu.memory_space<vmem>>, vector<1x64xbf16>
    tpu.vector_store %arg7[%c8_620, %c128_621], %393 {strides = array<i32>} : memref<9x1024xbf16, #tpu.memory_space<vmem>>, vector<1x64xbf16>,
    %c0_622 = arith.constant 0 : index
    %c5_623 = arith.constant 5 : index
    %c2_624 = arith.constant 2 : index
    %395 = vector.load %arg6[%c0_622, %c5_623, %c2_624] : memref<1x18x66xbf16, #tpu.memory_space<vmem>>, vector<1x1x64xbf16>
    %396 = vector.shape_cast %395 : vector<1x1x64xbf16> to vector<1x64xbf16>
    %c8_625 = arith.constant 8 : index
    %c192_626 = arith.constant 192 : index
    %397 = vector.load %arg7[%c8_625, %c192_626] : memref<9x1024xbf16, #tpu.memory_space<vmem>>, vector<1x64xbf16>
    tpu.vector_store %arg7[%c8_625, %c192_626], %396 {strides = array<i32>} : memref<9x1024xbf16, #tpu.memory_space<vmem>>, vector<1x64xbf16>,
    %c0_627 = arith.constant 0 : index
    %c6_628 = arith.constant 6 : index
    %c2_629 = arith.constant 2 : index
    %398 = vector.load %arg6[%c0_627, %c6_628, %c2_629] : memref<1x18x66xbf16, #tpu.memory_space<vmem>>, vector<1x1x64xbf16>
    %399 = vector.shape_cast %398 : vector<1x1x64xbf16> to vector<1x64xbf16>
    %c8_630 = arith.constant 8 : index
    %c256_631 = arith.constant 256 : index
    %400 = vector.load %arg7[%c8_630, %c256_631] : memref<9x1024xbf16, #tpu.memory_space<vmem>>, vector<1x64xbf16>
    tpu.vector_store %arg7[%c8_630, %c256_631], %399 {strides = array<i32>} : memref<9x1024xbf16, #tpu.memory_space<vmem>>, vector<1x64xbf16>,
    %c0_632 = arith.constant 0 : index
    %c7_633 = arith.constant 7 : index
    %c2_634 = arith.constant 2 : index
    %401 = vector.load %arg6[%c0_632, %c7_633, %c2_634] : memref<1x18x66xbf16, #tpu.memory_space<vmem>>, vector<1x1x64xbf16>
    %402 = vector.shape_cast %401 : vector<1x1x64xbf16> to vector<1x64xbf16>
    %c8_635 = arith.constant 8 : index
    %c320_636 = arith.constant 320 : index
    %403 = vector.load %arg7[%c8_635, %c320_636] : memref<9x1024xbf16, #tpu.memory_space<vmem>>, vector<1x64xbf16>
    tpu.vector_store %arg7[%c8_635, %c320_636], %402 {strides = array<i32>} : memref<9x1024xbf16, #tpu.memory_space<vmem>>, vector<1x64xbf16>,
    %c0_637 = arith.constant 0 : index
    %c8_638 = arith.constant 8 : index
    %c2_639 = arith.constant 2 : index
    %404 = vector.load %arg6[%c0_637, %c8_638, %c2_639] : memref<1x18x66xbf16, #tpu.memory_space<vmem>>, vector<1x1x64xbf16>
    %405 = vector.shape_cast %404 : vector<1x1x64xbf16> to vector<1x64xbf16>
    %c8_640 = arith.constant 8 : index
    %c384_641 = arith.constant 384 : index
    %406 = vector.load %arg7[%c8_640, %c384_641] : memref<9x1024xbf16, #tpu.memory_space<vmem>>, vector<1x64xbf16>
    tpu.vector_store %arg7[%c8_640, %c384_641], %405 {strides = array<i32>} : memref<9x1024xbf16, #tpu.memory_space<vmem>>, vector<1x64xbf16>,
    %c0_642 = arith.constant 0 : index
    %c9_643 = arith.constant 9 : index
    %c2_644 = arith.constant 2 : index
    %407 = vector.load %arg6[%c0_642, %c9_643, %c2_644] : memref<1x18x66xbf16, #tpu.memory_space<vmem>>, vector<1x1x64xbf16>
    %408 = vector.shape_cast %407 : vector<1x1x64xbf16> to vector<1x64xbf16>
    %c8_645 = arith.constant 8 : index
    %c448_646 = arith.constant 448 : index
    %409 = vector.load %arg7[%c8_645, %c448_646] : memref<9x1024xbf16, #tpu.memory_space<vmem>>, vector<1x64xbf16>
    tpu.vector_store %arg7[%c8_645, %c448_646], %408 {strides = array<i32>} : memref<9x1024xbf16, #tpu.memory_space<vmem>>, vector<1x64xbf16>,
    %c0_647 = arith.constant 0 : index
    %c10_648 = arith.constant 10 : index
    %c2_649 = arith.constant 2 : index
    %410 = vector.load %arg6[%c0_647, %c10_648, %c2_649] : memref<1x18x66xbf16, #tpu.memory_space<vmem>>, vector<1x1x64xbf16>
    %411 = vector.shape_cast %410 : vector<1x1x64xbf16> to vector<1x64xbf16>
    %c8_650 = arith.constant 8 : index
    %c512_651 = arith.constant 512 : index
    %412 = vector.load %arg7[%c8_650, %c512_651] : memref<9x1024xbf16, #tpu.memory_space<vmem>>, vector<1x64xbf16>
    tpu.vector_store %arg7[%c8_650, %c512_651], %411 {strides = array<i32>} : memref<9x1024xbf16, #tpu.memory_space<vmem>>, vector<1x64xbf16>,
    %c0_652 = arith.constant 0 : index
    %c11_653 = arith.constant 11 : index
    %c2_654 = arith.constant 2 : index
    %413 = vector.load %arg6[%c0_652, %c11_653, %c2_654] : memref<1x18x66xbf16, #tpu.memory_space<vmem>>, vector<1x1x64xbf16>
    %414 = vector.shape_cast %413 : vector<1x1x64xbf16> to vector<1x64xbf16>
    %c8_655 = arith.constant 8 : index
    %c576_656 = arith.constant 576 : index
    %415 = vector.load %arg7[%c8_655, %c576_656] : memref<9x1024xbf16, #tpu.memory_space<vmem>>, vector<1x64xbf16>
    tpu.vector_store %arg7[%c8_655, %c576_656], %414 {strides = array<i32>} : memref<9x1024xbf16, #tpu.memory_space<vmem>>, vector<1x64xbf16>,
    %c0_657 = arith.constant 0 : index
    %c12_658 = arith.constant 12 : index
    %c2_659 = arith.constant 2 : index
    %416 = vector.load %arg6[%c0_657, %c12_658, %c2_659] : memref<1x18x66xbf16, #tpu.memory_space<vmem>>, vector<1x1x64xbf16>
    %417 = vector.shape_cast %416 : vector<1x1x64xbf16> to vector<1x64xbf16>
    %c8_660 = arith.constant 8 : index
    %c640_661 = arith.constant 640 : index
    %418 = vector.load %arg7[%c8_660, %c640_661] : memref<9x1024xbf16, #tpu.memory_space<vmem>>, vector<1x64xbf16>
    tpu.vector_store %arg7[%c8_660, %c640_661], %417 {strides = array<i32>} : memref<9x1024xbf16, #tpu.memory_space<vmem>>, vector<1x64xbf16>,
    %c0_662 = arith.constant 0 : index
    %c13_663 = arith.constant 13 : index
    %c2_664 = arith.constant 2 : index
    %419 = vector.load %arg6[%c0_662, %c13_663, %c2_664] : memref<1x18x66xbf16, #tpu.memory_space<vmem>>, vector<1x1x64xbf16>
    %420 = vector.shape_cast %419 : vector<1x1x64xbf16> to vector<1x64xbf16>
    %c8_665 = arith.constant 8 : index
    %c704_666 = arith.constant 704 : index
    %421 = vector.load %arg7[%c8_665, %c704_666] : memref<9x1024xbf16, #tpu.memory_space<vmem>>, vector<1x64xbf16>
    tpu.vector_store %arg7[%c8_665, %c704_666], %420 {strides = array<i32>} : memref<9x1024xbf16, #tpu.memory_space<vmem>>, vector<1x64xbf16>,
    %c0_667 = arith.constant 0 : index
    %c14_668 = arith.constant 14 : index
    %c2_669 = arith.constant 2 : index
    %422 = vector.load %arg6[%c0_667, %c14_668, %c2_669] : memref<1x18x66xbf16, #tpu.memory_space<vmem>>, vector<1x1x64xbf16>
    %423 = vector.shape_cast %422 : vector<1x1x64xbf16> to vector<1x64xbf16>
    %c8_670 = arith.constant 8 : index
    %c768_671 = arith.constant 768 : index
    %424 = vector.load %arg7[%c8_670, %c768_671] : memref<9x1024xbf16, #tpu.memory_space<vmem>>, vector<1x64xbf16>
    tpu.vector_store %arg7[%c8_670, %c768_671], %423 {strides = array<i32>} : memref<9x1024xbf16, #tpu.memory_space<vmem>>, vector<1x64xbf16>,
    %c0_672 = arith.constant 0 : index
    %c15_673 = arith.constant 15 : index
    %c2_674 = arith.constant 2 : index
    %425 = vector.load %arg6[%c0_672, %c15_673, %c2_674] : memref<1x18x66xbf16, #tpu.memory_space<vmem>>, vector<1x1x64xbf16>
    %426 = vector.shape_cast %425 : vector<1x1x64xbf16> to vector<1x64xbf16>
    %c8_675 = arith.constant 8 : index
    %c832_676 = arith.constant 832 : index
    %427 = vector.load %arg7[%c8_675, %c832_676] : memref<9x1024xbf16, #tpu.memory_space<vmem>>, vector<1x64xbf16>
    tpu.vector_store %arg7[%c8_675, %c832_676], %426 {strides = array<i32>} : memref<9x1024xbf16, #tpu.memory_space<vmem>>, vector<1x64xbf16>,
    %c0_677 = arith.constant 0 : index
    %c16_678 = arith.constant 16 : index
    %c2_679 = arith.constant 2 : index
    %428 = vector.load %arg6[%c0_677, %c16_678, %c2_679] : memref<1x18x66xbf16, #tpu.memory_space<vmem>>, vector<1x1x64xbf16>
    %429 = vector.shape_cast %428 : vector<1x1x64xbf16> to vector<1x64xbf16>
    %c8_680 = arith.constant 8 : index
    %c896_681 = arith.constant 896 : index
    %430 = vector.load %arg7[%c8_680, %c896_681] : memref<9x1024xbf16, #tpu.memory_space<vmem>>, vector<1x64xbf16>
    tpu.vector_store %arg7[%c8_680, %c896_681], %429 {strides = array<i32>} : memref<9x1024xbf16, #tpu.memory_space<vmem>>, vector<1x64xbf16>,
    %c0_682 = arith.constant 0 : index
    %c17_683 = arith.constant 17 : index
    %c2_684 = arith.constant 2 : index
    %431 = vector.load %arg6[%c0_682, %c17_683, %c2_684] : memref<1x18x66xbf16, #tpu.memory_space<vmem>>, vector<1x1x64xbf16>
    %432 = vector.shape_cast %431 : vector<1x1x64xbf16> to vector<1x64xbf16>
    %c8_685 = arith.constant 8 : index
    %c960_686 = arith.constant 960 : index
    %433 = vector.load %arg7[%c8_685, %c960_686] : memref<9x1024xbf16, #tpu.memory_space<vmem>>, vector<1x64xbf16>
    tpu.vector_store %arg7[%c8_685, %c960_686], %432 {strides = array<i32>} : memref<9x1024xbf16, #tpu.memory_space<vmem>>, vector<1x64xbf16>,
    %c0_687 = arith.constant 0 : index
    %c0_688 = arith.constant 0 : index
    %434 = vector.load %arg3[%c0_687, %c0_688] : memref<8x9xbf16, #tpu.memory_space<vmem>>, vector<8x9xbf16>
    %c0_689 = arith.constant 0 : index
    %c0_690 = arith.constant 0 : index
    %435 = vector.load %arg7[%c0_689, %c0_690] : memref<9x1024xbf16, #tpu.memory_space<vmem>>, vector<9x1024xbf16>
    %cst = arith.constant dense<0.000000e+00> : vector<8x1024xf32>
    %436 = tpu.matmul %434, %435, %cst {dimension_numbers = #tpu.dot_dimension_numbers<[1], [0], [0], [1], [0, 0, 1, 1], [], []>} : vector<8x9xbf16>, vector<9x1024xbf16>, vector<8x1024xf32> -> vector<8x1024xf32>
    %c0_691 = arith.constant 0 : index
    %c0_692 = arith.constant 0 : index
    %437 = vector.load %arg4[%c0_691, %c0_692] : memref<8x1xf32, #tpu.memory_space<vmem>>, vector<8x1xf32>
    %438 = vector.broadcast %437 : vector<8x1xf32> to vector<8x1024xf32>
    %439 = arith.addf %436, %438 : vector<8x1024xf32>
    %cst_693 = arith.constant 0.000000e+00 : f32
    %440 = vector.broadcast %cst_693 : f32 to vector<8x1024xf32>
    %441 = arith.cmpf oge, %439, %440 : vector<8x1024xf32>
    %cst_694 = arith.constant 0.00999999977 : f32
    %442 = vector.broadcast %cst_694 : f32 to vector<8x1024xf32>
    %443 = arith.mulf %442, %439 : vector<8x1024xf32>
    %444 = arith.select %441, %439, %443 : vector<8x1024xi1>, vector<8x1024xf32>
    %445 = arith.truncf %444 : vector<8x1024xf32> to vector<8x1024xbf16>
    %c0_695 = arith.constant 0 : index
    %c0_696 = arith.constant 0 : index
    %c0_697 = arith.constant 0 : index
    %446 = vector.load %arg5[%c0_695, %c0_696, %c0_697] : memref<1x8x1024xbf16, #tpu.memory_space<vmem>>, vector<1x8x1024xbf16>
    %447 = vector.shape_cast %446 : vector<1x8x1024xbf16> to vector<8x1024xbf16>
    %448 = vector.shape_cast %445 : vector<8x1024xbf16> to vector<1x8x1024xbf16>
    tpu.vector_store %arg5[%c0_695, %c0_696, %c0_697], %448 {strides = array<i32>} : memref<1x8x1024xbf16, #tpu.memory_space<vmem>>, vector<1x8x1024xbf16>,
    return
  }
  func.func @transform_1(%arg0: i32, %arg1: i32) -> (i32, i32) {
    %c0_i32 = arith.constant 0 : i32
    %c0_i32_0 = arith.constant 0 : i32
    %c0_i32_1 = arith.constant 0 : i32
    return %c0_i32, %c0_i32_0 : i32, i32
  }
  func.func @transform_2(%arg0: i32, %arg1: i32) -> (i32, i32) {
    %c0_i32 = arith.constant 0 : i32
    %c0_i32_0 = arith.constant 0 : i32
    %c0_i32_1 = arith.constant 0 : i32
    return %c0_i32, %c0_i32_0 : i32, i32
  }
  func.func @transform_3(%arg0: i32, %arg1: i32) -> (i32, i32, i32) {
    %c0_i32 = arith.constant 0 : i32
    %c0_i32_0 = arith.constant 0 : i32
    return %arg0, %c0_i32, %arg1 : i32, i32, i32
  }
}

module attributes {stable_mosaic.version = 11 : i64} {
  func.func @_dense_conv_kernel(%arg0: i32, %arg1: i32, %arg2: memref<9x512xbf16, #tpu.memory_space<vmem>>, %arg3: memref<8x9xbf16, #tpu.memory_space<vmem>>, %arg4: memref<8x1xf32, #tpu.memory_space<vmem>>, %arg5: memref<8x512xbf16, #tpu.memory_space<vmem>>) attributes {dimension_semantics = [#tpu.dimension_semantics<parallel>, #tpu.dimension_semantics<parallel>], iteration_bounds = array<i64: 1, 16>, scalar_prefetch = 0 : i64, scratch_operands = 0 : i64, tpu.core_type = #tpu.core_type<tc>, window_params = [{transform_indices = @transform_0, window_bounds = array<i64: 9, 512>}, {transform_indices = @transform_1, window_bounds = array<i64: 8, 9>}, {transform_indices = @transform_2, window_bounds = array<i64: 8, 1>}, {transform_indices = @transform_3, window_bounds = array<i64: 8, 512>}]} {
    %c0 = arith.constant 0 : index
    %c0_0 = arith.constant 0 : index
    %0 = vector.load %arg3[%c0, %c0_0] : memref<8x9xbf16, #tpu.memory_space<vmem>>, vector<8x9xbf16>
    %c0_1 = arith.constant 0 : index
    %c0_2 = arith.constant 0 : index
    %1 = vector.load %arg2[%c0_1, %c0_2] : memref<9x512xbf16, #tpu.memory_space<vmem>>, vector<9x512xbf16>
    %cst = arith.constant dense<0.000000e+00> : vector<8x512xf32>
    %2 = tpu.matmul %0, %1, %cst {dimension_numbers = #tpu.dot_dimension_numbers<[1], [0], [0], [1], [0, 0, 1, 1], [], []>} : vector<8x9xbf16>, vector<9x512xbf16>, vector<8x512xf32> -> vector<8x512xf32>
    %c0_3 = arith.constant 0 : index
    %c0_4 = arith.constant 0 : index
    %3 = vector.load %arg4[%c0_3, %c0_4] : memref<8x1xf32, #tpu.memory_space<vmem>>, vector<8x1xf32>
    %4 = vector.broadcast %3 : vector<8x1xf32> to vector<8x512xf32>
    %5 = arith.addf %2, %4 : vector<8x512xf32>
    %cst_5 = arith.constant 0.000000e+00 : f32
    %6 = vector.broadcast %cst_5 : f32 to vector<8x512xf32>
    %7 = arith.cmpf oge, %5, %6 : vector<8x512xf32>
    %cst_6 = arith.constant 0.00999999977 : f32
    %8 = vector.broadcast %cst_6 : f32 to vector<8x512xf32>
    %9 = arith.mulf %8, %5 : vector<8x512xf32>
    %10 = arith.select %7, %5, %9 : vector<8x512xi1>, vector<8x512xf32>
    %11 = arith.truncf %10 : vector<8x512xf32> to vector<8x512xbf16>
    %c0_7 = arith.constant 0 : index
    %c0_8 = arith.constant 0 : index
    %12 = vector.load %arg5[%c0_7, %c0_8] : memref<8x512xbf16, #tpu.memory_space<vmem>>, vector<8x512xbf16>
    tpu.vector_store %arg5[%c0_7, %c0_8], %11 {strides = array<i32>} : memref<8x512xbf16, #tpu.memory_space<vmem>>, vector<8x512xbf16>,
    return
  }
  func.func @transform_0(%arg0: i32, %arg1: i32) -> (i32, i32) {
    %c0_i32 = arith.constant 0 : i32
    %c0_i32_0 = arith.constant 0 : i32
    return %c0_i32, %arg1 : i32, i32
  }
  func.func @transform_1(%arg0: i32, %arg1: i32) -> (i32, i32) {
    %c0_i32 = arith.constant 0 : i32
    %c0_i32_0 = arith.constant 0 : i32
    return %arg0, %c0_i32 : i32, i32
  }
  func.func @transform_2(%arg0: i32, %arg1: i32) -> (i32, i32) {
    %c0_i32 = arith.constant 0 : i32
    %c0_i32_0 = arith.constant 0 : i32
    return %arg0, %c0_i32 : i32, i32
  }
  func.func @transform_3(%arg0: i32, %arg1: i32) -> (i32, i32) {
    %c0_i32 = arith.constant 0 : i32
    return %arg0, %arg1 : i32, i32
  }
}

</mosaic_0001>

<bundles_post_ra>
// kernel: tpu_custom_call.1
= control target key start
LH: loop header
LB: loop body
LE: loop exit
PB: predicated region body
PF: predicated region fallthrough
CT: control target
= control target key end

     0   :  { %8 = vsyncpa [#allocation3], 0  ;;  %s908_s0 = inlined_call_operand.hbm [shape: bf16[9,8192], index: 0, kind: input, shape index: {}]   ;;  %s909_s1 = inlined_call_operand.vmem [shape: bf16[8,9], index: 1, kind: input, shape index: {}]   ;;  %s910_s2 = inlined_call_operand.vmem [shape: f32[8,1], index: 2, kind: input, shape index: {}]   ;;  %s911_s3 = inlined_call_operand.hbm [shape: bf16[8,8192], index: 3, kind: output, shape index: {}]  }
   0x1   :  { %10 = vsyncpa [#allocation3 + $0x1], 0 }
   0x2   :  { %11 = vsyncpa [#allocation4], 0 }
   0x3   :  { %13 = vsyncpa [#allocation4 + $0x1], 0  ;;  %s767_s12 = smov 0   ;;  %s769_s13 = smov 0  }
   0x4   :  { %s771_s14 = smov 0   ;;  %s773_s15 = smov 0  }
   0x5   :  { %s775_s16 = smov 0   ;;  %s777_s17 = smov 0  }
   0x6 LB: > { %s527_s18 = sadd.s32 4294967295, %s738_s17   ;;  %s528_s19 = sadd.s32 4294967294, %s738_s17   ;;  %s738_s17 = sphi %s777_s17, %s19_s17   ;;  %s734_s16 = sphi %s775_s16, %s921_s16   ;;  %s730_s15 = sphi %s773_s15, %s920_s15   ;;  %s726_s14 = sphi %s771_s14, %s919_s14   ;;  %s722_s13 = sphi %s769_s13, %s918_s13   ;;  %s718_s12 = sphi %s767_s12, %s917_s12  }
   0x7   : > { %s28_s20 = sadd.s32 1, %s734_s16  ;;  %s38_s21 = sadd.s32 1, %s726_s14 }
   0x8   : > { %p29_p0 = scmp.ge.s32.totalorder %s28_s20, 16  ;;  %p45_p1 = scmp.ne.s32.totalorder %s726_s14, %s722_s13 }
   0x9   : > { %p46_p2 = scmp.eq.s32.totalorder %s738_s17, 0  ;;  %p51_p3 = scmp.ne.s32.totalorder %s722_s13, %s718_s12 }
   0xa   : > { %s923_s20 = smov (%p29_p0, %s28_s20), 0  ;;  %p52_p5 = scmp.eq.s32.totalorder %s527_s18, 0 }
   0xb   : > { %p808_p4 = por %p46_p2, %p45_p1  ;;  %s35_s23 = ssub.s32 %s734_s16, %s923_s20 }
   0xc   : > { %p129_p6 = scmp.eq.s32.totalorder %s527_s18, 15  ;;  %p36_p7 = scmp.eq.s32.totalorder %s35_s23, 0 }
   0xd   : > { %p814_p8 = por %p52_p5, %p51_p3  ;;  %p135_p10 = scmp.eq.s32.totalorder %s528_s19, 15 }
   0xe   : > { %p818_p9 = por %p129_p6, %p45_p1  ;;  %p568_p12 = scmp.lt.s32.totalorder %s738_s17, 16 }
   0xf   : > { %s823_s26 = scalar_select %p36_p7, %s726_s14, %s38_s21  }
  0x10   : > { %p825_p11 = por %p135_p10, %p51_p3  ;;  %s169_s28 = sand.u32 1, %s726_s14  }
  0x11   : > { %s533_s29 = sshll.u32 %s169_s28, 5  ;;  %s552_s30 = sshll.u32 %s734_s16, 8 }
  0x12   : > { %s179_s6 = scalar_lea.hbm %s908_s0, %s552_s30  ;;  %s173_s7 = scalar_lea.vmem [#allocation2], %s533_s29 }
  0x13   : > { %s180_s8 = sshll.u32 %s173_s7, 4  ;;  %p837_p13 = pnand %p568_p12, %p808_p4  ;;  %s181_s8 = int_to_ptr.vmem [resolvable:$true] %s180_s8 }
  0x14   : > { %s170_s10 = scalar_lea.sflag [#allocation3], %s169_s28  ;;  %s643_s11 = scalar_lea.vmem %s181_s8, 512 }
  0x15   : > { %p632_p0 = pneg %p837_p13  ;;  %p644_p1 = scmp.ne.s32.totalorder %s181_s8, %s643_s11 }
  0x16   : > { %s740_s18 = smov [#allocation2]  }
  0x17   : > { %p646_p2 = pnand %p644_p1, %p632_p0  ;;  %s648_s19 = sshll.u32 %s740_s18, 4  ;;  %s649_s19 = int_to_ptr.vmem [resolvable:$false] %s648_s19 }
  0x18   : > { %s650_s21 = scalar_lea.vmem %s649_s19, 1024  ;;  %p651_p5 = scmp.lt.s32.totalorder %s181_s8, %s649_s19 }
  0x19   : > { %p647_p3 = pneg %p646_p2  ;;  %p652_p6 = scmp.lt.s32.totalorder %s650_s21, %s643_s11 }
  0x1b   : > { %p653_p7 = por %p652_p6, %p651_p5 }
  0x1d   : > { %p654_p10 = pnand %p653_p7, %p647_p3 }
  0x1f   : > { %657 = shalt.err (!%p654_p10)
}
  0x20   : > { %s741_s22 = smov 4096   ;;  %s742_s23 = smov 256  }
  0x21   : > { %s743_s28 = smov 16   ;;  %p536_p4 = scmp.ge.s32.totalorder %s738_s17, 1 }
  0x22   : > { %563 = dma.hbm_to_vmem [thread:$0]  (!%p837_p13), %s179_s6, 512, %s181_s8, %s170_s10, %s741_s22, %s742_s23, %s743_s28  }
  0x23   : > { %p188_p12 = scmp.lt.s32.totalorder %s738_s17, 17 }
  0x25   : > { %p189_p0 = pnand %p536_p4, %p188_p12 }
  0x26   : > { %s848_s29 = sand.u32 (!%p189_p0), 1, %s722_s13  }
  0x27   : > { %192 = sbr.rel (%p189_p0) target bundleno = 269 (0x10d), region = 32  ;;  %s537_s30 = sshll.u32 (!%p189_p0), %s848_s29, 5 }
  0x28   : > { %s195_s4 = scalar_lea.sflag (!%p189_p0), [#allocation3], %s848_s29  ;;  %s198_s5 = scalar_lea.vmem (!%p189_p0), [#allocation2], %s537_s30 }
  0x2c   : > { %709 = dma.done.wait (%p814_p8), %s195_s4, 512  }
  0x2d   : > { %711 = vsyncadd (%p814_p8), %s195_s4, 4294966784  ;;  %vm271_vm0 = vcmask 1043456   ;;  %v744_v0 = vmov 0   ;;  %vm272_vm1 = vcmask 1044480   ;;  %v745_v1 = vmov 65535   ;;  %v245_v10 = vld [vmem:[%s910_s2] sm:$0xff] }
  0x2e   : > { %319 = vmatprep.mubr.bf16.mxu0 %v744_v0  ;;  %360 = vmatprep.mubr.bf16.mxu1 %v744_v0  ;;  %v273_v2 = vsel %vm271_vm0, 4294967295, %v745_v1  ;;  %v624_v4 = vld [vmem:[%s198_s5 + $0x4] ss:$16 sps:$4 sm:$0x1f]   ;;  %v240_v13 = vld [vmem:[%s909_s1] sm:$0xf] }
  0x2f   : > { %623 = vset.pattern.permute.xlu0 %v744_v0  ;;  %v274_v3 = vsel %vm272_vm1, %v273_v2, 0  ;;  %v626_v5 = vld [vmem:[%s198_s5 + $0xc] ss:$16 sps:$4 sm:$0x1f]   ;;  %vm267_vm2 = vcmask 72704   ;;  %s538_s9 = sshll.u32 %s848_s29, 4 }
  0x30   : > { %v279_v6 = vand.u32 %v624_v4, %v274_v3  ;;  %v628_v7 = vld [vmem:[%s198_s5] ss:$16 sps:$4 sm:$0x1f]   ;;  %v629_v8 = vld [vmem:[%s198_s5 + $0x8] ss:$16 sps:$4 sm:$0x1f]   ;;  %v285_v9 = vand.u32 %v626_v5, %v274_v3  ;;  %248 = vperm.xlu0 %623, %v245_v10  }
  0x31   : > { %v276_v11 = vand.u32 %v628_v7, %v274_v3  ;;  %v282_v12 = vand.u32 %v629_v8, %v274_v3  ;;  %s555_s10 = sshll.u32 %s730_s15, 8  ;;  %s228_s11 = scalar_lea.vmem [#allocation5], %s538_s9 }
  0x32   : > { %301 = vmatprep.subr.bf16.mxu0 %v279_v6  ;;  %342 = vmatprep.subr.bf16.mxu1 %v285_v9  ;;  %s416_s18 = sshll.u32 %s228_s11, 4  ;;  %s867_s15 = scalar_lea.hbm %s911_s3, %s555_s10  ;;  %s417_s18 = int_to_ptr.vmem [resolvable:$true] %s416_s18 }
  0x33   : > { %302 = vmatpush1.bf16.msra.mxu0 %v276_v11  ;;  %343 = vmatpush1.bf16.msra.mxu1 %v282_v12  ;;  %s400_s22 = scalar_lea.sflag [#allocation4], %s848_s29  ;;  %s658_s23 = scalar_lea.vmem %s417_s18, 256 }
  0x34   : > { %p659_p8 = scmp.ne.s32.totalorder %s417_s18, %s658_s23  ;;  %s746_s28 = smov [#allocation5]  }
  0x35   : > { %s662_s30 = sshll.u32 %s746_s28, 4  ;;  %s663_s30 = int_to_ptr.vmem [resolvable:$false] %s662_s30 }
  0x36   : > { %543 = vmatmul.mubr.msk.bf16.vlgmr.msra.gmra.mxu0 %vm267_vm2, %v240_v13  ;;  %544 = vmatmul.mubr.msk.bf16.vlgmr.msra.gmra.mxu1 %vm267_vm2, %v240_v13  ;;  %p660_p13 = pnand %p659_p8, %p818_p9  ;;  %s664_s4 = scalar_lea.vmem %s663_s30, 512 }
  0x37   : > { %p665_p2 = scmp.lt.s32.totalorder %s417_s18, %s663_s30  ;;  %p666_p3 = scmp.lt.s32.totalorder %s664_s4, %s658_s23 }
  0x38   : > { %p661_p1 = pneg %p660_p13 }
  0x39   : > { %p667_p5 = por %p666_p3, %p665_p2 }
  0x3b   : > { %p668_p6 = pnand %p667_p5, %p661_p1 }
  0xab   : > { %v249_v14 = vpop.permute.xlu0 %248 }
  0xf6   : > { %v321_v15 = vpop.f32.mrf.mxu0  ;;  %v362_v16 = vpop.f32.mrf.mxu1 }
  0xf7   : > { %v322_v17 = vadd.f32 %v321_v15, %v249_v14  ;;  %v363_v18 = vadd.f32 %v362_v16, %v249_v14 }
  0xf8   : > { %v323_v19 = vpop.f32.mrf.mxu0  ;;  %v364_v20 = vpop.f32.mrf.mxu1 }
  0xf9   : > { %v373_v21 = vmul.f32 0.01, %v322_v17  ;;  %v375_v22 = vmul.f32 0.01, %v363_v18  ;;  %v324_v23 = vadd.f32 %v323_v19, %v249_v14  ;;  %v365_v24 = vadd.f32 %v364_v20, %v249_v14 }
  0xfa   : > { %v325_v25 = vpop.f32.mrf.mxu0  ;;  %v366_v26 = vpop.f32.mrf.mxu1  ;;  %vm369_vm3 = vcmp.ge.f32.partialorder %v322_v17, 0.0  ;;  %vm371_vm4 = vcmp.ge.f32.partialorder %v363_v18, 0.0 }
  0xfb   : > { %vm370_vm5 = vcmp.ge.f32.partialorder %v324_v23, 0.0  ;;  %v374_v27 = vmul.f32 0.01, %v324_v23  ;;  %vm372_vm6 = vcmp.ge.f32.partialorder %v365_v24, 0.0  ;;  %v376_v28 = vmul.f32 0.01, %v365_v24 }
  0xfc   : > { %v326_v29 = vpop.f32.mrf.mxu0  ;;  %v367_v30 = vpop.f32.mrf.mxu1  ;;  %v377_v31 = vsel %vm369_vm3, %v322_v17, %v373_v21  ;;  %v379_v32 = vsel %vm371_vm4, %v363_v18, %v375_v22 }
  0xfd   : > { %v378_v33 = vsel %vm370_vm5, %v324_v23, %v374_v27  ;;  %v380_v34 = vsel %vm372_vm6, %v365_v24, %v376_v28 }
  0xfe   : > { %v553_v35 = vpack.c.bf16 %v378_v33, %v377_v31  ;;  %v554_v36 = vpack.c.bf16 %v380_v34, %v379_v32 }
 0x100   : > { %397 = vst [vmem:[%s228_s11] sm:$0xff] %v553_v35  ;;  %398 = vst [vmem:[%s228_s11 + $0x8] sm:$0xff] %v554_v36 }
 0x101   : > { %671 = shalt.err (!%p668_p6)
}
 0x102   : > { %s672_s5 = scalar_lea.hbm %s867_s15, 256  ;;  %s676_s7 = scalar_lea.hbm %s911_s3, 4096 }
 0x103   : > { %p673_p7 = scmp.ne.s32.totalorder %s867_s15, %s672_s5  ;;  %p677_p12 = scmp.lt.s32.totalorder %s867_s15, %s911_s3 }
 0x104   : > { %p678_p0 = scmp.lt.s32.totalorder %s676_s7, %s672_s5 }
 0x105   : > { %p674_p10 = pnand %p673_p7, %p818_p9 }
 0x106   : > { %p679_p8 = por %p678_p0, %p677_p12 }
 0x107   : > { %p675_p4 = pneg %p674_p10 }
 0x109   : > { %p680_p13 = pnand %p679_p8, %p675_p4 }
 0x10b   : > { %683 = shalt.err (!%p680_p13)
}
 0x10c   : > { %558 = dma.vmem_to_hbm [thread:$0]  (%p818_p9), %s417_s18, 256, %s867_s15, %s400_s22  }
 0x10d PF: > { %p569_p1 = scmp.ge.s32.totalorder %s738_s17, 2  ;;  %s428_s9 = sand.u32 1, %s718_s12  }
 0x10e   : > { %s429_s10 = scalar_lea.sflag [#allocation4], %s428_s9 }
 0x10f   : > { %p565_p2 = pnand %p569_p1, %p825_p11 }
 0x111   : > { %p566_p3 = pneg %p565_p2 }
 0x113   : > { %713 = dma.done.wait (%p566_p3), %s429_s10, 256  }
 0x114   : > { %715 = vsyncadd (%p566_p3), %s429_s10, 4294967040  ;;  %s19_s17 = sadd.s32 1, %s738_s17   ;;  %s917_s12 = smov %s722_s13 }
 0x115   : > { %p16_p5 = scmp.ge.s32.totalorder %s19_s17, 18   ;;  %s918_s13 = smov %s726_s14 }
 0x116   : > { %s919_s14 = smov %s823_s26  ;;  %s920_s15 = smov %s734_s16 }
 0x117   : > { %s921_s16 = smov %s923_s20  ;;  %18 = sbr.rel (!%p16_p5) target bundleno = 6 (0x6), region = 83 }
 0x11c   :  { %434 = vsyncpa [#allocation3], 1 }
 0x11d   :  { %436 = vsyncpa [#allocation3 + $0x1], 1 }
 0x11e   :  { %437 = vsyncpa [#allocation4], 1 }
 0x11f   :  { %439 = vsyncpa [#allocation4 + $0x1], 1 }

</bundles_post_ra>
